<compile_context>
chip_gen: v6e
topology: v6e:2x2x1
jax: 0.10.0
libtpu: 0.0.40
codegen_flags: <defaults>
</compile_context>

<pallas_src>
import math

import jax
import jax.numpy as jnp
from jax.experimental import pallas as pl
from jax.experimental.pallas import tpu as pltpu

EMBED_DIM = 64
NHEAD = 2
HEAD_DIM = EMBED_DIM // NHEAD
NUM_LAYERS = 2
FF_DIM = 2048            # nn.TransformerEncoderLayer default dim_feedforward
SEQ_LEN = 6              # fc1 expects embedding_dim * 6 -> sequence length is 6
VOCAB = 64
LN_EPS = 1e-5


def _layer_norm(h, w, b):
    mu = jnp.mean(h, axis=-1, keepdims=True)
    var = jnp.mean((h - mu) ** 2, axis=-1, keepdims=True)
    return (h - mu) * jax.lax.rsqrt(var + LN_EPS) * w + b


def value_net_kernel(emb_ref, wqkv_ref, bqkv_ref, wo_ref, vecs_ref,
                     w1_ref, b1_ref, w2_ref, fc1w_ref, head_ref,
                     o_ref, x_ref):
    """One grid step == one encoder layer; the last step also runs the fc1/fc2/tanh head."""
    l = pl.program_id(0)

    @pl.when(l == 0)
    def _init():
        x_ref[...] = emb_ref[...]

    x = x_ref[...]                               # (B*S, D) f32, rows ordered b*S+s
    BS, D = x.shape
    B = BS // SEQ_LEN
    S = SEQ_LEN
    scale = 1.0 / math.sqrt(HEAD_DIM)

    wqkv = wqkv_ref[0]                           # (D, 3D) bf16, pre-transposed
    bqkv = bqkv_ref[0]                           # (1, 3D) f32
    wo = wo_ref[0]                               # (D, D)  bf16, pre-transposed
    vecs = vecs_ref[0]                           # (6, D)  f32: [bo, b2, ln1w, ln1b, ln2w, ln2b]
    bo, b2 = vecs[0:1, :], vecs[1:2, :]
    ln1w, ln1b = vecs[2:3, :], vecs[3:4, :]
    ln2w, ln2b = vecs[4:5, :], vecs[5:6, :]
    w1 = w1_ref[0]                               # (D, F)  bf16
    b1 = b1_ref[0]                               # (1, F)  f32
    w2 = w2_ref[0]                               # (F, D)  bf16

    # ---- multi-head self-attention (post-norm), single fused q/k/v projection ----
    qkv = jnp.dot(x.astype(jnp.bfloat16), wqkv,
                  preferred_element_type=jnp.float32) + bqkv      # (BS, 3D) f32
    heads = []
    for h in range(NHEAD):                       # NHEAD=2: static unroll, lane slices (no relayout)
        lo = h * HEAD_DIM
        qh = qkv[:, lo:lo + HEAD_DIM].reshape(B, S, HEAD_DIM)
        kh = qkv[:, D + lo:D + lo + HEAD_DIM].reshape(B, S, HEAD_DIM)
        vh = qkv[:, 2 * D + lo:2 * D + lo + HEAD_DIM].reshape(B, S, HEAD_DIM)
        s = jnp.einsum('bqe,bke->bqk', qh, kh,
                       preferred_element_type=jnp.float32) * scale
        s = s - jnp.max(s, axis=-1, keepdims=True)
        p = jnp.exp(s)
        p = p * pl.reciprocal(jnp.sum(p, axis=-1, keepdims=True), approx=True)
        heads.append(jnp.einsum('bqk,bke->bqe', p, vh,
                                preferred_element_type=jnp.float32))
    attn = jnp.concatenate(heads, axis=-1).reshape(BS, D)
    attn = jnp.dot(attn.astype(jnp.bfloat16), wo,
                   preferred_element_type=jnp.float32) + bo
    x = _layer_norm(x + attn, ln1w, ln1b)

    # ---- feed-forward block (ReLU, 2048 wide) ----
    ff = jnp.maximum(jnp.dot(x.astype(jnp.bfloat16), w1,
                             preferred_element_type=jnp.float32) + b1, 0.0)
    ff = jnp.dot(ff.astype(jnp.bfloat16), w2,
                 preferred_element_type=jnp.float32) + b2
    x = _layer_norm(x + ff, ln2w, ln2b)

    x_ref[...] = x

    # ---- last layer: fc1 -> fc2 -> tanh head ----
    @pl.when(l == NUM_LAYERS - 1)
    def _head():
        x3 = x.reshape(B, S, D)
        fc1b = head_ref[0:1, :]                  # (1, 128)
        fc2w = head_ref[1:2, :]                  # (1, 128)
        fc2b = head_ref[2:3, 0:1]                # (1, 1)
        h1 = fc1b
        for s_idx in range(SEQ_LEN):             # per-position dots avoid the (B, S*D) flatten
            h1 = h1 + jnp.dot(x3[:, s_idx, :].astype(jnp.bfloat16), fc1w_ref[s_idx],
                              preferred_element_type=jnp.float32)
        h2 = jnp.sum(h1 * fc2w, axis=-1, keepdims=True) + fc2b
        o_ref[...] = jnp.tanh(h2)


def init_params(key):
    """Parameters in PyTorch layout (Linear weight = (out_features, in_features))."""
    keys = jax.random.split(key, 20)
    it = iter(keys)

    def w(shape, scl=0.02):
        return scl * jax.random.normal(next(it), shape, dtype=jnp.float32)

    L, D, F = NUM_LAYERS, EMBED_DIM, FF_DIM
    return {
        "embedding": w((VOCAB, D), 1.0),
        # attention in_proj split into q/k/v (PyTorch stores them stacked as in_proj_weight)
        "wq": w((L, D, D)), "bq": w((L, D)),
        "wk": w((L, D, D)), "bk": w((L, D)),
        "wv": w((L, D, D)), "bv": w((L, D)),
        "wo": w((L, D, D)), "bo": w((L, D)),
        "ln1w": jnp.ones((L, D), jnp.float32), "ln1b": jnp.zeros((L, D), jnp.float32),
        "ln2w": jnp.ones((L, D), jnp.float32), "ln2b": jnp.zeros((L, D), jnp.float32),
        "w1": w((L, F, D)), "b1": w((L, F)),
        "w2": w((L, D, F)), "b2": w((L, D)),
        "fc1w": w((128, D * SEQ_LEN)), "fc1b": w((128,)),
        "fc2w": w((1, 128)), "fc2b": w((1,)),
    }


def pack_params(p):
    """One-time host-side repack: pre-transpose so the kernel computes x @ w with no `.T`,
    fuse q/k/v, stack the tiny per-layer vectors, cast big matmul weights to bfloat16."""
    bf16, f32 = jnp.bfloat16, jnp.float32
    t = lambda a: jnp.swapaxes(a, 1, 2)
    D, S = EMBED_DIM, SEQ_LEN

    wqkv = jnp.concatenate([t(p["wq"]), t(p["wk"]), t(p["wv"])], axis=2).astype(bf16)    # (L,D,3D)
    bqkv = jnp.concatenate([p["bq"], p["bk"], p["bv"]], axis=1)[:, None, :].astype(f32)  # (L,1,3D)
    vecs = jnp.stack([p["bo"], p["b2"], p["ln1w"], p["ln1b"], p["ln2w"], p["ln2b"]],
                     axis=1).astype(f32)                                                 # (L,6,D)
    headp = jnp.stack([p["fc1b"],
                       p["fc2w"][0],
                       jnp.zeros((128,), f32).at[0].set(p["fc2b"][0])], axis=0)          # (3,128)
    return {
        "embedding": p["embedding"].astype(f32),
        "wqkv": wqkv,
        "bqkv": bqkv,
        "wo": t(p["wo"]).astype(bf16),                                                   # (L,D,D)
        "vecs": vecs,
        "w1": t(p["w1"]).astype(bf16),                                                   # (L,D,F)
        "b1": p["b1"][:, None, :].astype(f32),                                           # (L,1,F)
        "w2": t(p["w2"]).astype(bf16),                                                   # (L,F,D)
        "fc1w": p["fc1w"].T.reshape(S, D, 128).astype(bf16),                             # (S,D,128)
        "headp": headp,
    }


def value_net_forward(tokens, kp):
    B = tokens.shape[0]
    # Embedding lookup is a data-dependent gather -> plain-JAX glue outside the kernel.
    emb = kp["embedding"][tokens].reshape(B * SEQ_LEN, EMBED_DIM)    # (B*S, D) f32

    ins = [emb, kp["wqkv"], kp["bqkv"], kp["wo"], kp["vecs"],
           kp["w1"], kp["b1"], kp["w2"], kp["fc1w"], kp["headp"]]

    def layer_spec(a):        # per-layer block, streamed (double-buffered) along the layer grid
        return pl.BlockSpec((1,) + a.shape[1:], lambda l: (l, 0, 0))

    def const_spec(a):        # layer-invariant block: same index each step -> fetched once
        return pl.BlockSpec(a.shape, lambda l: (0,) * a.ndim)

    in_specs = [const_spec(emb),
                layer_spec(kp["wqkv"]), layer_spec(kp["bqkv"]), layer_spec(kp["wo"]),
                layer_spec(kp["vecs"]), layer_spec(kp["w1"]), layer_spec(kp["b1"]),
                layer_spec(kp["w2"]),
                const_spec(kp["fc1w"]), const_spec(kp["headp"])]

    out = pl.pallas_call(
        value_net_kernel,
        out_shape=jax.ShapeDtypeStruct((B, 1), jnp.float32),
        grid=(NUM_LAYERS,),
        in_specs=in_specs,
        out_specs=pl.BlockSpec((B, 1), lambda l: (0, 0)),
        scratch_shapes=[pltpu.VMEM((B * SEQ_LEN, EMBED_DIM), jnp.float32)],
        compiler_params=pltpu.CompilerParams(
            dimension_semantics=("arbitrary",)),   # layers carry a dependency through x_ref
    )(*ins)
    return out[:, 0]                                # squeeze(-1)


def value_net_reference(tokens, kp):
    """Pure-JAX reference mirroring the packed-parameter math (bf16 weights, f32 accumulation)."""
    B = tokens.shape[0]
    D, S = EMBED_DIM, SEQ_LEN
    scale = 1.0 / math.sqrt(HEAD_DIM)
    x = kp["embedding"][tokens].reshape(B * S, D)
    for l in range(NUM_LAYERS):
        wqkv, bqkv, wo = kp["wqkv"][l], kp["bqkv"][l], kp["wo"][l]
        vecs = kp["vecs"][l]
        bo, b2 = vecs[0:1], vecs[1:2]
        ln1w, ln1b, ln2w, ln2b = vecs[2:3], vecs[3:4], vecs[4:5], vecs[5:6]
        w1, b1, w2 = kp["w1"][l], kp["b1"][l], kp["w2"][l]

        qkv = jnp.dot(x.astype(jnp.bfloat16), wqkv,
                      preferred_element_type=jnp.float32) + bqkv
        heads = []
        for h in range(NHEAD):
            lo = h * HEAD_DIM
            qh = qkv[:, lo:lo + HEAD_DIM].reshape(B, S, HEAD_DIM)
            kh = qkv[:, D + lo:D + lo + HEAD_DIM].reshape(B, S, HEAD_DIM)
            vh = qkv[:, 2 * D + lo:2 * D + lo + HEAD_DIM].reshape(B, S, HEAD_DIM)
            s = jnp.einsum('bqe,bke->bqk', qh, kh) * scale
            p = jax.nn.softmax(s, axis=-1)
            heads.append(jnp.einsum('bqk,bke->bqe', p, vh))
        attn = jnp.concatenate(heads, axis=-1).reshape(B * S, D)
        attn = jnp.dot(attn.astype(jnp.bfloat16), wo,
                       preferred_element_type=jnp.float32) + bo
        x = _layer_norm(x + attn, ln1w, ln1b)

        ff = jnp.maximum(jnp.dot(x.astype(jnp.bfloat16), w1,
                                 preferred_element_type=jnp.float32) + b1, 0.0)
        ff = jnp.dot(ff.astype(jnp.bfloat16), w2,
                     preferred_element_type=jnp.float32) + b2
        x = _layer_norm(x + ff, ln2w, ln2b)

    x3 = x.reshape(B, S, D)
    h1 = kp["headp"][0:1]
    for s_idx in range(S):
        h1 = h1 + jnp.dot(x3[:, s_idx, :].astype(jnp.bfloat16), kp["fc1w"][s_idx],
                          preferred_element_type=jnp.float32)
    h2 = jnp.sum(h1 * kp["headp"][1:2], axis=-1, keepdims=True) + kp["headp"][2:3, 0:1]
    return jnp.tanh(h2)[:, 0]


if __name__ == "__main__":
    key = jax.random.PRNGKey(0)
    pkey, tkey = jax.random.split(key)
    params = init_params(pkey)
    kparams = pack_params(params)
    # batch=2, seq=6 token ids in [0, 64)  (nn.Embedding(64, 64); fc1 expects 64*6 features)
    tokens = jax.random.randint(tkey, (2, SEQ_LEN), 0, VOCAB, dtype=jnp.int32)

    out = value_net_forward(tokens, kparams)
    jax.block_until_ready(out)
    assert out.shape == (2,)
    assert bool(jnp.all(jnp.isfinite(out)))

    ref = value_net_reference(tokens, kparams)
    jax.block_until_ready(ref)
    max_err = float(jnp.max(jnp.abs(out - ref)))
    assert max_err < 2e-2, f"kernel vs reference mismatch: {max_err}"

    print("KERNEL_OK")
</pallas_src>

<mosaic_0001>
module attributes {stable_mosaic.version = 11 : i64} {
  func.func @value_net_kernel(%arg0: i32, %arg1: memref<12x64xf32, #tpu.memory_space<vmem>>, %arg2: memref<1x64x192xbf16, #tpu.memory_space<vmem>>, %arg3: memref<1x1x192xf32, #tpu.memory_space<vmem>>, %arg4: memref<1x64x64xbf16, #tpu.memory_space<vmem>>, %arg5: memref<1x6x64xf32, #tpu.memory_space<vmem>>, %arg6: memref<1x64x2048xbf16, #tpu.memory_space<vmem>>, %arg7: memref<1x1x2048xf32, #tpu.memory_space<vmem>>, %arg8: memref<1x2048x64xbf16, #tpu.memory_space<vmem>>, %arg9: memref<6x64x128xbf16, #tpu.memory_space<vmem>>, %arg10: memref<3x128xf32, #tpu.memory_space<vmem>>, %arg11: memref<2x1xf32, #tpu.memory_space<vmem>>, %arg12: memref<12x64xf32, #tpu.memory_space<vmem>>) attributes {dimension_semantics = [#tpu.dimension_semantics<arbitrary>], iteration_bounds = array<i64: 2>, scalar_prefetch = 0 : i64, scratch_operands = 1 : i64, tpu.core_type = #tpu.core_type<tc>, window_params = [{pipeline_mode = #tpu.pipeline_mode<synchronous>, transform_indices = @transform_0, window_bounds = array<i64: 12, 64>}, {transform_indices = @transform_1, window_bounds = array<i64: 1, 64, 192>}, {transform_indices = @transform_2, window_bounds = array<i64: 1, 1, 192>}, {transform_indices = @transform_3, window_bounds = array<i64: 1, 64, 64>}, {transform_indices = @transform_4, window_bounds = array<i64: 1, 6, 64>}, {transform_indices = @transform_5, window_bounds = array<i64: 1, 64, 2048>}, {transform_indices = @transform_6, window_bounds = array<i64: 1, 1, 2048>}, {transform_indices = @transform_7, window_bounds = array<i64: 1, 2048, 64>}, {pipeline_mode = #tpu.pipeline_mode<synchronous>, transform_indices = @transform_8, window_bounds = array<i64: 6, 64, 128>}, {pipeline_mode = #tpu.pipeline_mode<synchronous>, transform_indices = @transform_9, window_bounds = array<i64: 3, 128>}, {pipeline_mode = #tpu.pipeline_mode<synchronous>, transform_indices = @transform_10, window_bounds = array<i64: 2, 1>}]} {
    %c0_i32 = arith.constant 0 : i32
    %0 = arith.cmpi eq, %arg0, %c0_i32 : i32
    %1 = arith.extui %0 : i1 to i32
    %c0_i32_0 = arith.constant 0 : i32
    %2 = arith.cmpi ne, %1, %c0_i32_0 : i32
    scf.if %2 {
      %c0_50 = arith.constant 0 : index
      %c0_51 = arith.constant 0 : index
      %134 = vector.load %arg1[%c0_50, %c0_51] : memref<12x64xf32, #tpu.memory_space<vmem>>, vector<12x64xf32>
      %c0_52 = arith.constant 0 : index
      %c0_53 = arith.constant 0 : index
      %135 = vector.load %arg12[%c0_52, %c0_53] : memref<12x64xf32, #tpu.memory_space<vmem>>, vector<12x64xf32>
      tpu.vector_store %arg12[%c0_52, %c0_53], %134 {strides = array<i32>} : memref<12x64xf32, #tpu.memory_space<vmem>>, vector<12x64xf32>,
    } else {
    }
    %c0 = arith.constant 0 : index
    %c0_1 = arith.constant 0 : index
    %3 = vector.load %arg12[%c0, %c0_1] : memref<12x64xf32, #tpu.memory_space<vmem>>, vector<12x64xf32>
    %c0_2 = arith.constant 0 : index
    %c0_3 = arith.constant 0 : index
    %c0_4 = arith.constant 0 : index
    %4 = vector.load %arg2[%c0_2, %c0_3, %c0_4] : memref<1x64x192xbf16, #tpu.memory_space<vmem>>, vector<1x64x192xbf16>
    %5 = vector.shape_cast %4 : vector<1x64x192xbf16> to vector<64x192xbf16>
    %c0_5 = arith.constant 0 : index
    %c0_6 = arith.constant 0 : index
    %c0_7 = arith.constant 0 : index
    %6 = vector.load %arg3[%c0_5, %c0_6, %c0_7] : memref<1x1x192xf32, #tpu.memory_space<vmem>>, vector<1x1x192xf32>
    %7 = vector.shape_cast %6 : vector<1x1x192xf32> to vector<1x192xf32>
    %c0_8 = arith.constant 0 : index
    %c0_9 = arith.constant 0 : index
    %c0_10 = arith.constant 0 : index
    %8 = vector.load %arg4[%c0_8, %c0_9, %c0_10] : memref<1x64x64xbf16, #tpu.memory_space<vmem>>, vector<1x64x64xbf16>
    %9 = vector.shape_cast %8 : vector<1x64x64xbf16> to vector<64x64xbf16>
    %c0_11 = arith.constant 0 : index
    %c0_12 = arith.constant 0 : index
    %c0_13 = arith.constant 0 : index
    %10 = vector.load %arg5[%c0_11, %c0_12, %c0_13] : memref<1x6x64xf32, #tpu.memory_space<vmem>>, vector<1x6x64xf32>
    %11 = vector.shape_cast %10 : vector<1x6x64xf32> to vector<6x64xf32>
    %12 = vector.extract_strided_slice %11 {offsets = [0, 0], sizes = [1, 64], strides = [1, 1]} : vector<6x64xf32> to vector<1x64xf32>
    %13 = vector.extract_strided_slice %11 {offsets = [1, 0], sizes = [1, 64], strides = [1, 1]} : vector<6x64xf32> to vector<1x64xf32>
    %14 = vector.extract_strided_slice %11 {offsets = [2, 0], sizes = [1, 64], strides = [1, 1]} : vector<6x64xf32> to vector<1x64xf32>
    %15 = vector.extract_strided_slice %11 {offsets = [3, 0], sizes = [1, 64], strides = [1, 1]} : vector<6x64xf32> to vector<1x64xf32>
    %16 = vector.extract_strided_slice %11 {offsets = [4, 0], sizes = [1, 64], strides = [1, 1]} : vector<6x64xf32> to vector<1x64xf32>
    %17 = vector.extract_strided_slice %11 {offsets = [5, 0], sizes = [1, 64], strides = [1, 1]} : vector<6x64xf32> to vector<1x64xf32>
    %c0_14 = arith.constant 0 : index
    %c0_15 = arith.constant 0 : index
    %c0_16 = arith.constant 0 : index
    %18 = vector.load %arg6[%c0_14, %c0_15, %c0_16] : memref<1x64x2048xbf16, #tpu.memory_space<vmem>>, vector<1x64x2048xbf16>
    %19 = vector.shape_cast %18 : vector<1x64x2048xbf16> to vector<64x2048xbf16>
    %c0_17 = arith.constant 0 : index
    %c0_18 = arith.constant 0 : index
    %c0_19 = arith.constant 0 : index
    %20 = vector.load %arg7[%c0_17, %c0_18, %c0_19] : memref<1x1x2048xf32, #tpu.memory_space<vmem>>, vector<1x1x2048xf32>
    %21 = vector.shape_cast %20 : vector<1x1x2048xf32> to vector<1x2048xf32>
    %c0_20 = arith.constant 0 : index
    %c0_21 = arith.constant 0 : index
    %c0_22 = arith.constant 0 : index
    %22 = vector.load %arg8[%c0_20, %c0_21, %c0_22] : memref<1x2048x64xbf16, #tpu.memory_space<vmem>>, vector<1x2048x64xbf16>
    %23 = vector.shape_cast %22 : vector<1x2048x64xbf16> to vector<2048x64xbf16>
    %24 = arith.truncf %3 : vector<12x64xf32> to vector<12x64xbf16>
    %cst = arith.constant dense<0.000000e+00> : vector<12x192xf32>
    %25 = tpu.matmul %24, %5, %cst {dimension_numbers = #tpu.dot_dimension_numbers<[1], [0], [0], [1], [0, 0, 1, 1], [], []>} : vector<12x64xbf16>, vector<64x192xbf16>, vector<12x192xf32> -> vector<12x192xf32>
    %26 = vector.broadcast %7 : vector<1x192xf32> to vector<12x192xf32>
    %27 = arith.addf %25, %26 : vector<12x192xf32>
    %28 = vector.extract_strided_slice %27 {offsets = [0, 0], sizes = [12, 32], strides = [1, 1]} : vector<12x192xf32> to vector<12x32xf32>
    %29 = vector.shape_cast %28 : vector<12x32xf32> to vector<2x6x32xf32>
    %30 = vector.extract_strided_slice %27 {offsets = [0, 64], sizes = [12, 32], strides = [1, 1]} : vector<12x192xf32> to vector<12x32xf32>
    %31 = vector.shape_cast %30 : vector<12x32xf32> to vector<2x6x32xf32>
    %32 = vector.extract_strided_slice %27 {offsets = [0, 128], sizes = [12, 32], strides = [1, 1]} : vector<12x192xf32> to vector<12x32xf32>
    %33 = vector.shape_cast %32 : vector<12x32xf32> to vector<2x6x32xf32>
    "tpu.trace_start"() <{level = 10 : i32, message = "bqe,bke->bqk"}> : () -> ()
    %cst_23 = arith.constant dense<0.000000e+00> : vector<2x6x6xf32>
    %34 = tpu.matmul %29, %31, %cst_23 {dimension_numbers = #tpu.dot_dimension_numbers<[2], [2], [1], [1], [0, 0, 0, 1, 1, 1], [0], [0]>} : vector<2x6x32xf32>, vector<2x6x32xf32>, vector<2x6x6xf32> -> vector<2x6x6xf32>
    "tpu.trace_stop"() : () -> ()
    %cst_24 = arith.constant 0.176776692 : f32
    %35 = vector.broadcast %cst_24 : f32 to vector<2x6x6xf32>
    %36 = arith.mulf %34, %35 : vector<2x6x6xf32>
    %cst_25 = arith.constant dense<0xFF800000> : vector<2x6xf32>
    %37 = vector.multi_reduction <maximumf>, %36, %cst_25 [2] : vector<2x6x6xf32> to vector<2x6xf32>
    %38 = vector.shape_cast %37 : vector<2x6xf32> to vector<2x6x1xf32>
    %39 = vector.broadcast %38 : vector<2x6x1xf32> to vector<2x6x6xf32>
    %40 = arith.subf %36, %39 : vector<2x6x6xf32>
    %41 = math.exp %40 : vector<2x6x6xf32>
    %cst_26 = arith.constant dense<0.000000e+00> : vector<2x6xf32>
    %42 = vector.multi_reduction <add>, %41, %cst_26 [2] : vector<2x6x6xf32> to vector<2x6xf32>
    %43 = vector.shape_cast %42 : vector<2x6xf32> to vector<2x6x1xf32>
    %44 = tpu.reciprocal %43 {approx = true} : vector<2x6x1xf32> -> vector<2x6x1xf32>
    %45 = vector.broadcast %44 : vector<2x6x1xf32> to vector<2x6x6xf32>
    %46 = arith.mulf %41, %45 : vector<2x6x6xf32>
    "tpu.trace_start"() <{level = 10 : i32, message = "bqk,bke->bqe"}> : () -> ()
    %cst_27 = arith.constant dense<0.000000e+00> : vector<2x6x32xf32>
    %47 = tpu.matmul %46, %33, %cst_27 {dimension_numbers = #tpu.dot_dimension_numbers<[2], [1], [1], [2], [0, 0, 0, 1, 1, 2], [0], [0]>} : vector<2x6x6xf32>, vector<2x6x32xf32>, vector<2x6x32xf32> -> vector<2x6x32xf32>
    "tpu.trace_stop"() : () -> ()
    %48 = vector.extract_strided_slice %27 {offsets = [0, 32], sizes = [12, 32], strides = [1, 1]} : vector<12x192xf32> to vector<12x32xf32>
    %49 = vector.shape_cast %48 : vector<12x32xf32> to vector<2x6x32xf32>
    %50 = vector.extract_strided_slice %27 {offsets = [0, 96], sizes = [12, 32], strides = [1, 1]} : vector<12x192xf32> to vector<12x32xf32>
    %51 = vector.shape_cast %50 : vector<12x32xf32> to vector<2x6x32xf32>
    %52 = vector.extract_strided_slice %27 {offsets = [0, 160], sizes = [12, 32], strides = [1, 1]} : vector<12x192xf32> to vector<12x32xf32>
    %53 = vector.shape_cast %52 : vector<12x32xf32> to vector<2x6x32xf32>
    "tpu.trace_start"() <{level = 10 : i32, message = "bqe,bke->bqk"}> : () -> ()
    %cst_28 = arith.constant dense<0.000000e+00> : vector<2x6x6xf32>
    %54 = tpu.matmul %49, %51, %cst_28 {dimension_numbers = #tpu.dot_dimension_numbers<[2], [2], [1], [1], [0, 0, 0, 1, 1, 1], [0], [0]>} : vector<2x6x32xf32>, vector<2x6x32xf32>, vector<2x6x6xf32> -> vector<2x6x6xf32>
    "tpu.trace_stop"() : () -> ()
    %cst_29 = arith.constant 0.176776692 : f32
    %55 = vector.broadcast %cst_29 : f32 to vector<2x6x6xf32>
    %56 = arith.mulf %54, %55 : vector<2x6x6xf32>
    %cst_30 = arith.constant dense<0xFF800000> : vector<2x6xf32>
    %57 = vector.multi_reduction <maximumf>, %56, %cst_30 [2] : vector<2x6x6xf32> to vector<2x6xf32>
    %58 = vector.shape_cast %57 : vector<2x6xf32> to vector<2x6x1xf32>
    %59 = vector.broadcast %58 : vector<2x6x1xf32> to vector<2x6x6xf32>
    %60 = arith.subf %56, %59 : vector<2x6x6xf32>
    %61 = math.exp %60 : vector<2x6x6xf32>
    %cst_31 = arith.constant dense<0.000000e+00> : vector<2x6xf32>
    %62 = vector.multi_reduction <add>, %61, %cst_31 [2] : vector<2x6x6xf32> to vector<2x6xf32>
    %63 = vector.shape_cast %62 : vector<2x6xf32> to vector<2x6x1xf32>
    %64 = tpu.reciprocal %63 {approx = true} : vector<2x6x1xf32> -> vector<2x6x1xf32>
    %65 = vector.broadcast %64 : vector<2x6x1xf32> to vector<2x6x6xf32>
    %66 = arith.mulf %61, %65 : vector<2x6x6xf32>
    "tpu.trace_start"() <{level = 10 : i32, message = "bqk,bke->bqe"}> : () -> ()
    %cst_32 = arith.constant dense<0.000000e+00> : vector<2x6x32xf32>
    %67 = tpu.matmul %66, %53, %cst_32 {dimension_numbers = #tpu.dot_dimension_numbers<[2], [1], [1], [2], [0, 0, 0, 1, 1, 2], [0], [0]>} : vector<2x6x6xf32>, vector<2x6x32xf32>, vector<2x6x32xf32> -> vector<2x6x32xf32>
    "tpu.trace_stop"() : () -> ()
    %68 = tpu.concatenate %47, %67 in 2 : vector<2x6x32xf32>, vector<2x6x32xf32> -> vector<2x6x64xf32>
    %69 = vector.shape_cast %68 : vector<2x6x64xf32> to vector<12x64xf32>
    %70 = arith.truncf %69 : vector<12x64xf32> to vector<12x64xbf16>
    %cst_33 = arith.constant dense<0.000000e+00> : vector<12x64xf32>
    %71 = tpu.matmul %70, %9, %cst_33 {dimension_numbers = #tpu.dot_dimension_numbers<[1], [0], [0], [1], [0, 0, 1, 1], [], []>} : vector<12x64xbf16>, vector<64x64xbf16>, vector<12x64xf32> -> vector<12x64xf32>
    %72 = vector.broadcast %12 : vector<1x64xf32> to vector<12x64xf32>
    %73 = arith.addf %71, %72 : vector<12x64xf32>
    %74 = arith.addf %3, %73 : vector<12x64xf32>
    %cst_34 = arith.constant dense<0.000000e+00> : vector<12xf32>
    %75 = vector.multi_reduction <add>, %74, %cst_34 [1] : vector<12x64xf32> to vector<12xf32>
    %76 = vector.shape_cast %75 : vector<12xf32> to vector<12x1xf32>
    %cst_35 = arith.constant 6.400000e+01 : f32
    %77 = vector.broadcast %cst_35 : f32 to vector<12x1xf32>
    %78 = arith.divf %76, %77 : vector<12x1xf32>
    %79 = vector.broadcast %78 : vector<12x1xf32> to vector<12x64xf32>
    %80 = arith.subf %74, %79 : vector<12x64xf32>
    %81 = arith.mulf %80, %80 : vector<12x64xf32>
    %cst_36 = arith.constant dense<0.000000e+00> : vector<12xf32>
    %82 = vector.multi_reduction <add>, %81, %cst_36 [1] : vector<12x64xf32> to vector<12xf32>
    %83 = vector.shape_cast %82 : vector<12xf32> to vector<12x1xf32>
    %cst_37 = arith.constant 6.400000e+01 : f32
    %84 = vector.broadcast %cst_37 : f32 to vector<12x1xf32>
    %85 = arith.divf %83, %84 : vector<12x1xf32>
    %86 = vector.broadcast %78 : vector<12x1xf32> to vector<12x64xf32>
    %87 = arith.subf %74, %86 : vector<12x64xf32>
    %cst_38 = arith.constant 9.99999974E-6 : f32
    %88 = vector.broadcast %cst_38 : f32 to vector<12x1xf32>
    %89 = arith.addf %85, %88 : vector<12x1xf32>
    %90 = math.rsqrt %89 : vector<12x1xf32>
    %91 = vector.broadcast %90 : vector<12x1xf32> to vector<12x64xf32>
    %92 = arith.mulf %87, %91 : vector<12x64xf32>
    %93 = vector.broadcast %14 : vector<1x64xf32> to vector<12x64xf32>
    %94 = arith.mulf %92, %93 : vector<12x64xf32>
    %95 = vector.broadcast %15 : vector<1x64xf32> to vector<12x64xf32>
    %96 = arith.addf %94, %95 : vector<12x64xf32>
    %97 = arith.truncf %96 : vector<12x64xf32> to vector<12x64xbf16>
    %cst_39 = arith.constant dense<0.000000e+00> : vector<12x2048xf32>
    %98 = tpu.matmul %97, %19, %cst_39 {dimension_numbers = #tpu.dot_dimension_numbers<[1], [0], [0], [1], [0, 0, 1, 1], [], []>} : vector<12x64xbf16>, vector<64x2048xbf16>, vector<12x2048xf32> -> vector<12x2048xf32>
    %99 = vector.broadcast %21 : vector<1x2048xf32> to vector<12x2048xf32>
    %100 = arith.addf %98, %99 : vector<12x2048xf32>
    %cst_40 = arith.constant 0.000000e+00 : f32
    %101 = vector.broadcast %cst_40 : f32 to vector<12x2048xf32>
    %102 = arith.maximumf %100, %101 : vector<12x2048xf32>
    %103 = arith.truncf %102 : vector<12x2048xf32> to vector<12x2048xbf16>
    %cst_41 = arith.constant dense<0.000000e+00> : vector<12x64xf32>
    %104 = tpu.matmul %103, %23, %cst_41 {dimension_numbers = #tpu.dot_dimension_numbers<[1], [0], [0], [1], [0, 0, 1, 1], [], []>} : vector<12x2048xbf16>, vector<2048x64xbf16>, vector<12x64xf32> -> vector<12x64xf32>
    %105 = vector.broadcast %13 : vector<1x64xf32> to vector<12x64xf32>
    %106 = arith.addf %104, %105 : vector<12x64xf32>
    %107 = arith.addf %96, %106 : vector<12x64xf32>
    %cst_42 = arith.constant dense<0.000000e+00> : vector<12xf32>
    %108 = vector.multi_reduction <add>, %107, %cst_42 [1] : vector<12x64xf32> to vector<12xf32>
    %109 = vector.shape_cast %108 : vector<12xf32> to vector<12x1xf32>
    %cst_43 = arith.constant 6.400000e+01 : f32
    %110 = vector.broadcast %cst_43 : f32 to vector<12x1xf32>
    %111 = arith.divf %109, %110 : vector<12x1xf32>
    %112 = vector.broadcast %111 : vector<12x1xf32> to vector<12x64xf32>
    %113 = arith.subf %107, %112 : vector<12x64xf32>
    %114 = arith.mulf %113, %113 : vector<12x64xf32>
    %cst_44 = arith.constant dense<0.000000e+00> : vector<12xf32>
    %115 = vector.multi_reduction <add>, %114, %cst_44 [1] : vector<12x64xf32> to vector<12xf32>
    %116 = vector.shape_cast %115 : vector<12xf32> to vector<12x1xf32>
    %cst_45 = arith.constant 6.400000e+01 : f32
    %117 = vector.broadcast %cst_45 : f32 to vector<12x1xf32>
    %118 = arith.divf %116, %117 : vector<12x1xf32>
    %119 = vector.broadcast %111 : vector<12x1xf32> to vector<12x64xf32>
    %120 = arith.subf %107, %119 : vector<12x64xf32>
    %cst_46 = arith.constant 9.99999974E-6 : f32
    %121 = vector.broadcast %cst_46 : f32 to vector<12x1xf32>
    %122 = arith.addf %118, %121 : vector<12x1xf32>
    %123 = math.rsqrt %122 : vector<12x1xf32>
    %124 = vector.broadcast %123 : vector<12x1xf32> to vector<12x64xf32>
    %125 = arith.mulf %120, %124 : vector<12x64xf32>
    %126 = vector.broadcast %16 : vector<1x64xf32> to vector<12x64xf32>
    %127 = arith.mulf %125, %126 : vector<12x64xf32>
    %128 = vector.broadcast %17 : vector<1x64xf32> to vector<12x64xf32>
    %129 = arith.addf %127, %128 : vector<12x64xf32>
    %c0_47 = arith.constant 0 : index
    %c0_48 = arith.constant 0 : index
    %130 = vector.load %arg12[%c0_47, %c0_48] : memref<12x64xf32, #tpu.memory_space<vmem>>, vector<12x64xf32>
    tpu.vector_store %arg12[%c0_47, %c0_48], %129 {strides = array<i32>} : memref<12x64xf32, #tpu.memory_space<vmem>>, vector<12x64xf32>,
    %c1_i32 = arith.constant 1 : i32
    %131 = arith.cmpi eq, %arg0, %c1_i32 : i32
    %132 = arith.extui %131 : i1 to i32
    %c0_i32_49 = arith.constant 0 : i32
    %133 = arith.cmpi ne, %132, %c0_i32_49 : i32
    scf.if %133 {
      %134 = vector.shape_cast %129 : vector<12x64xf32> to vector<2x6x64xf32>
      %c0_50 = arith.constant 0 : index
      %c0_51 = arith.constant 0 : index
      %135 = vector.load %arg10[%c0_50, %c0_51] : memref<3x128xf32, #tpu.memory_space<vmem>>, vector<1x128xf32>
      %c1 = arith.constant 1 : index
      %c0_52 = arith.constant 0 : index
      %136 = vector.load %arg10[%c1, %c0_52] : memref<3x128xf32, #tpu.memory_space<vmem>>, vector<1x128xf32>
      %c2 = arith.constant 2 : index
      %c0_53 = arith.constant 0 : index
      %137 = vector.load %arg10[%c2, %c0_53] : memref<3x128xf32, #tpu.memory_space<vmem>>, vector<1x1xf32>
      %138 = vector.extract_strided_slice %134 {offsets = [0, 0, 0], sizes = [2, 1, 64], strides = [1, 1, 1]} : vector<2x6x64xf32> to vector<2x1x64xf32>
      %139 = vector.shape_cast %138 : vector<2x1x64xf32> to vector<2x64xf32>
      %140 = arith.truncf %139 : vector<2x64xf32> to vector<2x64xbf16>
      %c0_54 = arith.constant 0 : index
      %c0_55 = arith.constant 0 : index
      %c0_56 = arith.constant 0 : index
      %141 = vector.load %arg9[%c0_54, %c0_55, %c0_56] : memref<6x64x128xbf16, #tpu.memory_space<vmem>>, vector<1x64x128xbf16>
      %142 = vector.shape_cast %141 : vector<1x64x128xbf16> to vector<64x128xbf16>
      %cst_57 = arith.constant dense<0.000000e+00> : vector<2x128xf32>
      %143 = tpu.matmul %140, %142, %cst_57 {dimension_numbers = #tpu.dot_dimension_numbers<[1], [0], [0], [1], [0, 0, 1, 1], [], []>} : vector<2x64xbf16>, vector<64x128xbf16>, vector<2x128xf32> -> vector<2x128xf32>
      %144 = vector.broadcast %135 : vector<1x128xf32> to vector<2x128xf32>
      %145 = arith.addf %144, %143 : vector<2x128xf32>
      %146 = vector.extract_strided_slice %134 {offsets = [0, 1, 0], sizes = [2, 1, 64], strides = [1, 1, 1]} : vector<2x6x64xf32> to vector<2x1x64xf32>
      %147 = vector.shape_cast %146 : vector<2x1x64xf32> to vector<2x64xf32>
      %148 = arith.truncf %147 : vector<2x64xf32> to vector<2x64xbf16>
      %c1_58 = arith.constant 1 : index
      %c0_59 = arith.constant 0 : index
      %c0_60 = arith.constant 0 : index
      %149 = vector.load %arg9[%c1_58, %c0_59, %c0_60] : memref<6x64x128xbf16, #tpu.memory_space<vmem>>, vector<1x64x128xbf16>
      %150 = vector.shape_cast %149 : vector<1x64x128xbf16> to vector<64x128xbf16>
      %cst_61 = arith.constant dense<0.000000e+00> : vector<2x128xf32>
      %151 = tpu.matmul %148, %150, %cst_61 {dimension_numbers = #tpu.dot_dimension_numbers<[1], [0], [0], [1], [0, 0, 1, 1], [], []>} : vector<2x64xbf16>, vector<64x128xbf16>, vector<2x128xf32> -> vector<2x128xf32>
      %152 = arith.addf %145, %151 : vector<2x128xf32>
      %153 = vector.extract_strided_slice %134 {offsets = [0, 2, 0], sizes = [2, 1, 64], strides = [1, 1, 1]} : vector<2x6x64xf32> to vector<2x1x64xf32>
      %154 = vector.shape_cast %153 : vector<2x1x64xf32> to vector<2x64xf32>
      %155 = arith.truncf %154 : vector<2x64xf32> to vector<2x64xbf16>
      %c2_62 = arith.constant 2 : index
      %c0_63 = arith.constant 0 : index
      %c0_64 = arith.constant 0 : index
      %156 = vector.load %arg9[%c2_62, %c0_63, %c0_64] : memref<6x64x128xbf16, #tpu.memory_space<vmem>>, vector<1x64x128xbf16>
      %157 = vector.shape_cast %156 : vector<1x64x128xbf16> to vector<64x128xbf16>
      %cst_65 = arith.constant dense<0.000000e+00> : vector<2x128xf32>
      %158 = tpu.matmul %155, %157, %cst_65 {dimension_numbers = #tpu.dot_dimension_numbers<[1], [0], [0], [1], [0, 0, 1, 1], [], []>} : vector<2x64xbf16>, vector<64x128xbf16>, vector<2x128xf32> -> vector<2x128xf32>
      %159 = arith.addf %152, %158 : vector<2x128xf32>
      %160 = vector.extract_strided_slice %134 {offsets = [0, 3, 0], sizes = [2, 1, 64], strides = [1, 1, 1]} : vector<2x6x64xf32> to vector<2x1x64xf32>
      %161 = vector.shape_cast %160 : vector<2x1x64xf32> to vector<2x64xf32>
      %162 = arith.truncf %161 : vector<2x64xf32> to vector<2x64xbf16>
      %c3 = arith.constant 3 : index
      %c0_66 = arith.constant 0 : index
      %c0_67 = arith.constant 0 : index
      %163 = vector.load %arg9[%c3, %c0_66, %c0_67] : memref<6x64x128xbf16, #tpu.memory_space<vmem>>, vector<1x64x128xbf16>
      %164 = vector.shape_cast %163 : vector<1x64x128xbf16> to vector<64x128xbf16>
      %cst_68 = arith.constant dense<0.000000e+00> : vector<2x128xf32>
      %165 = tpu.matmul %162, %164, %cst_68 {dimension_numbers = #tpu.dot_dimension_numbers<[1], [0], [0], [1], [0, 0, 1, 1], [], []>} : vector<2x64xbf16>, vector<64x128xbf16>, vector<2x128xf32> -> vector<2x128xf32>
      %166 = arith.addf %159, %165 : vector<2x128xf32>
      %167 = vector.extract_strided_slice %134 {offsets = [0, 4, 0], sizes = [2, 1, 64], strides = [1, 1, 1]} : vector<2x6x64xf32> to vector<2x1x64xf32>
      %168 = vector.shape_cast %167 : vector<2x1x64xf32> to vector<2x64xf32>
      %169 = arith.truncf %168 : vector<2x64xf32> to vector<2x64xbf16>
      %c4 = arith.constant 4 : index
      %c0_69 = arith.constant 0 : index
      %c0_70 = arith.constant 0 : index
      %170 = vector.load %arg9[%c4, %c0_69, %c0_70] : memref<6x64x128xbf16, #tpu.memory_space<vmem>>, vector<1x64x128xbf16>
      %171 = vector.shape_cast %170 : vector<1x64x128xbf16> to vector<64x128xbf16>
      %cst_71 = arith.constant dense<0.000000e+00> : vector<2x128xf32>
      %172 = tpu.matmul %169, %171, %cst_71 {dimension_numbers = #tpu.dot_dimension_numbers<[1], [0], [0], [1], [0, 0, 1, 1], [], []>} : vector<2x64xbf16>, vector<64x128xbf16>, vector<2x128xf32> -> vector<2x128xf32>
      %173 = arith.addf %166, %172 : vector<2x128xf32>
      %174 = vector.extract_strided_slice %134 {offsets = [0, 5, 0], sizes = [2, 1, 64], strides = [1, 1, 1]} : vector<2x6x64xf32> to vector<2x1x64xf32>
      %175 = vector.shape_cast %174 : vector<2x1x64xf32> to vector<2x64xf32>
      %176 = arith.truncf %175 : vector<2x64xf32> to vector<2x64xbf16>
      %c5 = arith.constant 5 : index
      %c0_72 = arith.constant 0 : index
      %c0_73 = arith.constant 0 : index
      %177 = vector.load %arg9[%c5, %c0_72, %c0_73] : memref<6x64x128xbf16, #tpu.memory_space<vmem>>, vector<1x64x128xbf16>
      %178 = vector.shape_cast %177 : vector<1x64x128xbf16> to vector<64x128xbf16>
      %cst_74 = arith.constant dense<0.000000e+00> : vector<2x128xf32>
      %179 = tpu.matmul %176, %178, %cst_74 {dimension_numbers = #tpu.dot_dimension_numbers<[1], [0], [0], [1], [0, 0, 1, 1], [], []>} : vector<2x64xbf16>, vector<64x128xbf16>, vector<2x128xf32> -> vector<2x128xf32>
      %180 = arith.addf %173, %179 : vector<2x128xf32>
      %181 = vector.broadcast %136 : vector<1x128xf32> to vector<2x128xf32>
      %182 = arith.mulf %180, %181 : vector<2x128xf32>
      %cst_75 = arith.constant dense<0.000000e+00> : vector<2xf32>
      %183 = vector.multi_reduction <add>, %182, %cst_75 [1] : vector<2x128xf32> to vector<2xf32>
      %184 = vector.shape_cast %183 : vector<2xf32> to vector<2x1xf32>
      %185 = vector.broadcast %137 : vector<1x1xf32> to vector<2x1xf32>
      %186 = arith.addf %184, %185 : vector<2x1xf32>
      %187 = math.tanh %186 : vector<2x1xf32>
      %c0_76 = arith.constant 0 : index
      %c0_77 = arith.constant 0 : index
      %188 = vector.load %arg11[%c0_76, %c0_77] : memref<2x1xf32, #tpu.memory_space<vmem>>, vector<2x1xf32>
      tpu.vector_store %arg11[%c0_76, %c0_77], %187 {strides = array<i32>} : memref<2x1xf32, #tpu.memory_space<vmem>>, vector<2x1xf32>,
    } else {
    }
    return
  }
  func.func @transform_0(%arg0: i32) -> (i32, i32) {
    %c0_i32 = arith.constant 0 : i32
    %c0_i32_0 = arith.constant 0 : i32
    %c0_i32_1 = arith.constant 0 : i32
    return %c0_i32, %c0_i32_0 : i32, i32
  }
  func.func @transform_1(%arg0: i32) -> (i32, i32, i32) {
    %c0_i32 = arith.constant 0 : i32
    %c0_i32_0 = arith.constant 0 : i32
    %c0_i32_1 = arith.constant 0 : i32
    return %arg0, %c0_i32, %c0_i32_0 : i32, i32, i32
  }
  func.func @transform_2(%arg0: i32) -> (i32, i32, i32) {
    %c0_i32 = arith.constant 0 : i32
    %c0_i32_0 = arith.constant 0 : i32
    %c0_i32_1 = arith.constant 0 : i32
    return %arg0, %c0_i32, %c0_i32_0 : i32, i32, i32
  }
  func.func @transform_3(%arg0: i32) -> (i32, i32, i32) {
    %c0_i32 = arith.constant 0 : i32
    %c0_i32_0 = arith.constant 0 : i32
    %c0_i32_1 = arith.constant 0 : i32
    return %arg0, %c0_i32, %c0_i32_0 : i32, i32, i32
  }
  func.func @transform_4(%arg0: i32) -> (i32, i32, i32) {
    %c0_i32 = arith.constant 0 : i32
    %c0_i32_0 = arith.constant 0 : i32
    %c0_i32_1 = arith.constant 0 : i32
    return %arg0, %c0_i32, %c0_i32_0 : i32, i32, i32
  }
  func.func @transform_5(%arg0: i32) -> (i32, i32, i32) {
    %c0_i32 = arith.constant 0 : i32
    %c0_i32_0 = arith.constant 0 : i32
    %c0_i32_1 = arith.constant 0 : i32
    return %arg0, %c0_i32, %c0_i32_0 : i32, i32, i32
  }
  func.func @transform_6(%arg0: i32) -> (i32, i32, i32) {
    %c0_i32 = arith.constant 0 : i32
    %c0_i32_0 = arith.constant 0 : i32
    %c0_i32_1 = arith.constant 0 : i32
    return %arg0, %c0_i32, %c0_i32_0 : i32, i32, i32
  }
  func.func @transform_7(%arg0: i32) -> (i32, i32, i32) {
    %c0_i32 = arith.constant 0 : i32
    %c0_i32_0 = arith.constant 0 : i32
    %c0_i32_1 = arith.constant 0 : i32
    return %arg0, %c0_i32, %c0_i32_0 : i32, i32, i32
  }
  func.func @transform_8(%arg0: i32) -> (i32, i32, i32) {
    %c0_i32 = arith.constant 0 : i32
    %c0_i32_0 = arith.constant 0 : i32
    %c0_i32_1 = arith.constant 0 : i32
    %c0_i32_2 = arith.constant 0 : i32
    return %c0_i32, %c0_i32_0, %c0_i32_1 : i32, i32, i32
  }
  func.func @transform_9(%arg0: i32) -> (i32, i32) {
    %c0_i32 = arith.constant 0 : i32
    %c0_i32_0 = arith.constant 0 : i32
    %c0_i32_1 = arith.constant 0 : i32
    return %c0_i32, %c0_i32_0 : i32, i32
  }
  func.func @transform_10(%arg0: i32) -> (i32, i32) {
    %c0_i32 = arith.constant 0 : i32
    %c0_i32_0 = arith.constant 0 : i32
    %c0_i32_1 = arith.constant 0 : i32
    return %c0_i32, %c0_i32_0 : i32, i32
  }
}

</mosaic_0001>

<bundles_post_ra>
// kernel: tpu_custom_call.1
= control target key start
LH: loop header
LB: loop body
LE: loop exit
PB: predicated region body
PF: predicated region fallthrough
CT: control target
= control target key end

     0   :  { %s5436_s13 = smov 0   ;;  %s6122_s0 = inlined_call_operand.vmem [shape: f32[12,64], index: 0, kind: input, shape index: {}]   ;;  %s6123_s1 = inlined_call_operand.vmem [shape: bf16[2,64,192], index: 1, kind: input, shape index: {}]   ;;  %s6124_s2 = inlined_call_operand.vmem [shape: f32[2,1,192], index: 2, kind: input, shape index: {}]   ;;  %s6125_s3 = inlined_call_operand.vmem [shape: bf16[2,64,64], index: 3, kind: input, shape index: {}]   ;;  %s6126_s4 = inlined_call_operand.vmem [shape: f32[2,6,64], index: 4, kind: input, shape index: {}]   ;;  %s6127_s5 = inlined_call_operand.vmem [shape: bf16[2,64,2048], index: 5, kind: input, shape index: {}]   ;;  %s6128_s6 = inlined_call_operand.vmem [shape: f32[2,1,2048], index: 6, kind: input, shape index: {}]   ;;  %s6129_s7 = inlined_call_operand.vmem [shape: bf16[2,2048,64], index: 7, kind: input, shape index: {}]   ;;  %s6130_s8 = inlined_call_operand.vmem [shape: bf16[6,64,128], index: 8, kind: input, shape index: {}]   ;;  %s6131_s9 = inlined_call_operand.vmem [shape: f32[3,128], index: 9, kind: input, shape index: {}]   ;;  %s6132_s10 = inlined_call_operand.vmem [shape: f32[2,1], index: 10, kind: output, shape index: {}]  }
   0x1   :  { %6133 = sst [smem:[#allocation3_spill]] %s6123_s1 }
   0x2   :  { %6134 = sst [smem:[#allocation4_spill]] %s6124_s2 }
   0x3 LB: > { %s5442_s14 = sadd.s32 4294967295, %s5370_s13   ;;  %p4478_p0 = scmp.ge.s32.totalorder %s5370_s13, 1  ;;  %s5370_s13 = sphi %s5436_s13, %s20_s13  }
   0x4   : > { %p364_p1 = scmp.lt.s32.totalorder %s5370_s13, 3 }
   0x6   : > { %p365_p2 = pnand %p4478_p0, %p364_p1 }
   0x7   : > { %p424_p3 = scmp.lt.s32.totalorder (!%p365_p2), %s5442_s14, 1  ;;  %s6135_s1 = sld [smem:[#allocation3_spill]] (!%p365_p2) }
   0x8   : > { %368 = sbr.rel (%p365_p2) target bundleno = 3482 (0xd9a), region = 60  ;;  %s6136_s2 = sld [smem:[#allocation4_spill]] (!%p365_p2) }
   0x9   : > { %p4490_p4 = scmp.ne.s32.totalorder (!%p365_p2), %s5442_s14, 0 }
   0xd   : > { %s425_s15 = scalar_select %p424_p3, %s5442_s14, 1 }
   0xf   : > { %s4797_s16 = sshll.u32 %s425_s15, 6  ;;  %s4481_s17 = sshll.u32 %s425_s15, 1 }
  0x10   : > { %s5451_s20 = scalar_lea.vmem %s6135_s1, %s4797_s16  ;;  %s5456_s23 = scalar_lea.vmem %s6136_s2, %s4481_s17 }
  0x11   : > { %s4798_s24 = sshll.u32 %s425_s15, 5  ;;  %s4484_s25 = sshll.u32 %s425_s15, 3 }
  0x12   : > { %s5461_s28 = scalar_lea.vmem %s6125_s3, %s4798_s24  ;;  %s5466_s11 = scalar_lea.vmem %s6126_s4, %s4484_s25 }
  0x13   : > { %s4799_s12 = sshll.u32 %s425_s15, 9  ;;  %s4487_s16 = sshll.u32 %s425_s15, 4 }
  0x14   : > { %s5471_s21 = scalar_lea.vmem %s6127_s5, %s4799_s12  ;;  %s5476_s1 = scalar_lea.vmem %s6128_s6, %s4487_s16 }
  0x15   : > { %s4800_s26 = sshll.u32 %s425_s15, 10  ;;  %460 = sbr.rel (%p4490_p4) target bundleno = 29 (0x1d), region = 64 }
  0x16   : > { %s5481_s2 = scalar_lea.vmem %s6129_s7, %s4800_s26 }
  0x1a   : > { %v461_v0 = vld [vmem:[%s6122_s0] sm:$0xff]  ;;  %vm463_vm0 = vcmask 523264   ;;  %v462_v1 = vld [vmem:[%s6122_s0 + $0x8] sm:$0xf]  ;;  %vm465_vm1 = vcmask 519168  }
  0x1b   : > { %464 = vst.msk [vmem:[#allocation2] sm:$0xff] %vm463_vm0, %v461_v0 }
  0x1c   : > { %466 = vst.msk [vmem:[#allocation2 + $0x8] sm:$0xf] %vm465_vm1, %v462_v1 }
  0x1d PF: > { %v5169_v2 = vld [vmem:[%s5451_s20 + $0x34] ss:$8 sps:$4 sm:$0xff]   ;;  %v5171_v3 = vld [vmem:[%s5451_s20 + $0x30] ss:$8 sps:$4 sm:$0xff]   ;;  %v5372_v4 = vmov 0   ;;  %vm861_vm2 = vcmask 523264   ;;  %v811_v15 = vlaneseq }
  0x1e   : > { %897 = vmatprep.mubr.bf16.mxu0 %v5372_v4  ;;  %873 = vmatprep.subr.bf16.mxu0 %v5169_v2  ;;  %v5172_v5 = vld [vmem:[%s5451_s20 + $0x24] ss:$8 sps:$4 sm:$0xff]   ;;  %v5174_v6 = vld [vmem:[%s5451_s20 + $0x20] ss:$8 sps:$4 sm:$0xff]   ;;  %v5175_v7 = vld [vmem:[%s5451_s20 + $0x14] ss:$8 sps:$4 sm:$0xff]  }
  0x1f   : > { %874 = vmatpush1.bf16.msra.mxu0 %v5171_v3  ;;  %v5177_v8 = vld [vmem:[%s5451_s20 + $0x10] ss:$8 sps:$4 sm:$0xff]   ;;  %v5178_v9 = vld [vmem:[%s5451_s20 + $0x4] ss:$8 sps:$4 sm:$0xff]   ;;  %v5180_v10 = vld [vmem:[%s5451_s20] ss:$8 sps:$4 sm:$0xff]  }
  0x20   : > { %875 = vmatprep.subr.bf16.mxu0 %v5172_v5  ;;  %v5373_v14 = vmov 0.0   ;;  %v5508_v16 = vshrl.u32 %v811_v15, 7  ;;  %v5374_v17 = vmov 1983009808   ;;  %v477_v20 = vld [vmem:[%s5456_s23] sm:$0x3] }
  0x21   : > { %5033 = vmatprep.subr.mxu1 %v5373_v14  ;;  %v912_v18 = vunpack.c.l.s4 %v5374_v17  ;;  %vm5375_vm3 = vmmov 0   ;;  %s5376_s15 = smov 64   ;;  %vm980_vm4 = vcmask 261120   ;;  %vm1192_vm5 = vcmask 1045504   ;;  %s5377_s20 = smov 32  }
  0x22   : > { %v5499_v11 = vld [vmem:[#allocation2] sm:$0xff]  ;;  %v5511_v19 = vsub.s32 0, %v5508_v16  ;;  %v5515_v22 = vsub.s32 1, %v5508_v16  ;;  %5035 = vmatprep.mubr.msk.f32.mxu1 %vm5375_vm3, %v5373_v14  ;;  %vm1149_vm6 = vcmask 46080   ;;  %s5378_s23 = smov 96   ;;  %vm1188_vm7 = vcmask 48128  }
  0x23   : > { %876 = vmatpush1.bf16.msra.mxu0 %v5174_v6  ;;  %v5501_v12 = vld [vmem:[#allocation2 + $0x8] sm:$0xf]  ;;  %v913_v21 = vunpack.c.0.s8 %v912_v18  ;;  %vm1839_vm8 = vcmask 519168   ;;  %p4721_p5 = scmp.ne.s32.totalorder %s5442_s14, 1 }
  0x24   : > { %877 = vmatprep.subr.bf16.mxu0 %v5175_v7  ;;  %v809_v13 = vpack.c.bf16 %v5501_v12, %v5499_v11  ;;  %v814_v23 = vrot.slane %v477_v20, %v5511_v19  ;;  %v818_v25 = vrot.slane %v477_v20, %v5515_v22 }
  0x25   : > { %v5519_v24 = vsub.s32 %v913_v21, %v5508_v16 }
  0x27   : > { %878 = vmatpush1.bf16.msra.mxu0 %v5177_v8 }
  0x28   : > { %879 = vmatprep.subr.bf16.mxu0 %v5178_v9 }
  0x2b   : > { %880 = vmatpush1.bf16.msra.mxu0 %v5180_v10 }
  0x2c   : > { %5028 = vmatprep.subr.mxu0 %v5373_v14 }
  0x2e   : > { %4499 = vmatmul.mubr.msk.bf16.vlgmr.msra.gmra.mxu0 %vm861_vm2, %v809_v13 }
  0x2f   : > { %5030 = vmatprep.mubr.msk.f32.mxu0 %vm5375_vm3, %v5373_v14 }
  0xee   : > { %v899_v26 = vpop.f32.mrf.mxu0 }
  0xef   : > { %v900_v27 = vadd.f32 %v899_v26, %v814_v23 }
  0xf0   : > { %v901_v28 = vpop.f32.mrf.mxu0 }
  0xf1   : > { %v910_v29 = vcombine.high %v900_v27, %v900_v27  ;;  %v917_v30 = vrot.slane %v900_v27, %v5519_v24  ;;  %v902_v31 = vadd.f32 %v901_v28, %v818_v25 }
  0xf2   : > { %v903_v32 = vpop.f32.mrf.mxu0 }
  0xf3   : > { %v924_v33 = vrot.slane %v910_v29, %v5519_v24  ;;  %v925_v34 = vcombine.high %v917_v30, %v917_v30  ;;  %v937_v35 = vcombine.high %v902_v31, %v902_v31  ;;  %v904_v36 = vadd.f32 %v903_v32, %v814_v23 }
  0xf4   : > { %v905_v37 = vpop.f32.mrf.mxu0  ;;  %v944_v58 = vrot.slane %v902_v31, %v5519_v24 }
  0xf5   : > { %v962_v38 = vcombine.low %v917_v30, %v925_v34  ;;  %v951_v39 = vrot.slane %v937_v35, %v5519_v24  ;;  %v926_v40 = vcombine.high %v924_v33, %v924_v33  ;;  %v933_v41 = vrot.slane %v904_v36, %v5519_v24 }
  0xf6   : > { %v906_v42 = vadd.f32 %v905_v37, %v818_v25  ;;  %v976_v44 = vrot.slane %v924_v33, %v5519_v24  ;;  %v952_v59 = vcombine.high %v944_v58, %v944_v58 }
  0xf7   : > { %v969_v43 = vrot.slane %v962_v38, %v5519_v24  ;;  %v953_v45 = vcombine.high %v951_v39, %v951_v39  ;;  %v934_v46 = vcombine.high %v933_v41, %v933_v41  ;;  %v1055_v47 = vcombine.low %v926_v40, %v933_v41 }
  0xf8   : > { %v960_v48 = vrot.slane %v906_v42, %v5519_v24  ;;  %v1172_v60 = vcombine.low %v944_v58, %v952_v59  ;;  %v1186_v0 = vrot.slane %v951_v39, %v5519_v24 }
  0xf9   : > { %v977_v49 = vcombine.low %v969_v43, %v976_v44  ;;  %v1062_v50 = vrot.slane %v1055_v47, %v5519_v24  ;;  %v1069_v51 = vrot.slane %v934_v46, %v5519_v24 }
  0xfa   : > { %v961_v52 = vcombine.high %v960_v48, %v960_v48  ;;  %v1265_v53 = vcombine.low %v953_v45, %v960_v48  ;;  %v1179_v62 = vrot.slane %v1172_v60, %v5519_v24 }
  0xfb   : > { %978 = vrot.lane.b32.xlu0 %v977_v49, %s5376_s15  ;;  %v1070_v56 = vcombine.low %v1062_v50, %v1069_v51 }
  0xfc   : > { %v1272_v54 = vrot.slane %v1265_v53, %v5519_v24  ;;  %v1279_v55 = vrot.slane %v961_v52, %v5519_v24  ;;  %v5549_v1 = vcombine.low %v1179_v62, %v1186_v0 }
  0xfe   : > { %v5537_v57 = vcombine.low %v1272_v54, %v1279_v55 }
  0xff   : > { %1071 = vrot.lane.b32.xlu0 %v1070_v56, %s5376_s15 }
 0x16d   : > { %v979_v61 = vpop.permute.xlu0 %978 }
 0x16e   : > { %5029 = vmatpush3.xpose.msk.msra.mxu0 %vm980_vm4, %v979_v61 }
 0x16f   : > { %5053 = vmatprep.subr.mxu0 %v5373_v14 }
 0x171   : > { %5031 = vmatmul.mubr.msk.f32.vlgmr.msra.gmra.mxu0 %vm980_vm4, %v977_v49  ;;  %v1072_v63 = vpop.permute.xlu0 %1071 }
 0x172   : > { %5034 = vmatpush3.xpose.msk.msra.mxu1 %vm980_vm4, %v1072_v63  ;;  %5055 = vmatprep.mubr.msk.f32.mxu0 %vm5375_vm3, %v5373_v14 }
 0x173   : > { %5038 = vmatprep.subr.mxu1 %v5373_v14 }
 0x175   : > { %5036 = vmatmul.mubr.msk.f32.vlgmr.msra.gmra.mxu1 %vm980_vm4, %v1070_v56 }
 0x176   : > { %5039 = vmatpush3.msk.msra.mxu1 %vm1192_vm5, %v5549_v1  ;;  %5040 = vmatprep.mubr.msk.f32.mxu1 %vm5375_vm3, %v5373_v14 }
 0x177   : > { %5043 = vmatprep.subr.mxu1 %v5373_v14 }
 0x231   : > { %v1051_v2 = vpop.f32.mrf.mxu0 }
 0x232   : > { %v1147_v3 = vmul.f32 0.17677669, %v1051_v2 }
 0x233   : > { %v5032_v5 = vpop.f32.mrf.mxu0 }
 0x234   : > { %v1150_v6 = vsel %vm1149_vm6, %v1147_v3, -inf  ;;  %v5181_v5 = vld [vmem:[%s5461_s28 + $0x18] sm:$0xff]  }
 0x235   : > { %1151 = vmax.xlane.f32.xlu1 %v1150_v6  ;;  %v1143_v7 = vpop.f32.mrf.mxu1 }
 0x236   : > { %v1148_v8 = vmul.f32 0.17677669, %v1143_v7  ;;  %v5182_v7 = vld [vmem:[%s5461_s28 + $0x10] sm:$0xff]  }
 0x237   : > { %v5037_v9 = vpop.f32.mrf.mxu1 }
 0x238   : > { %v1153_v10 = vsel %vm1149_vm6, %v1148_v8, -inf  ;;  %v5183_v9 = vld [vmem:[%s5461_s28 + $0x8] sm:$0xff]  }
 0x239   : > { %1154 = vmax.xlane.f32.xlu1 %v1153_v10  ;;  %v5184_v10 = vld [vmem:[%s5461_s28] sm:$0xff]  }
 0x24a   : > { %1358 = vrot.lane.b32.xlu1 %v977_v49, %s5377_s20 }
 0x24e   : > { %1436 = vrot.lane.b32.xlu1 %v1070_v56, %s5377_s20 }
 0x252   : > { %1356 = vrot.lane.b32.xlu1 %v977_v49, %s5378_s23 }
 0x2be   : > { %v1152_v13 = vpop.xlane.xlu1 %1151 }
 0x2bf   : > { %v1156_v15 = vsub.f32 %v1147_v3, %v1152_v13 }
 0x2c1   : > { %v1158_v17 = vmul.f32 1.442695, %v1156_v15 }
 0x2c2   : > { %v1155_v18 = vpop.xlane.xlu1 %1154 }
 0x2c3   : > { %5313 = vpow2.f32 %v1158_v17  ;;  %v1157_v20 = vsub.f32 %v1148_v8, %v1155_v18 }
 0x2c5   : > { %v1160_v21 = vmul.f32 1.442695, %v1157_v20 }
 0x2c6   : > { %v1359_v23 = vpop.permute.xlu1 %1358 }
 0x2c7   : > { %5315 = vpow2.f32 %v1160_v21 }
 0x2ca   : > { %v1437_v25 = vpop.permute.xlu1 %1436 }
 0x2cb   : > { %5054 = vmatpush3.xpose.msk.msra.mxu0 %vm980_vm4, %v1437_v25 }
 0x2cc   : > { %5063 = vmatprep.subr.mxu0 %v5373_v14 }
 0x2ce   : > { %v1357_v30 = vpop.permute.xlu1 %1356 }
 0x2d0   : > { %v5314_v26 = vpop.eup %5313 }
 0x2d1   : > { %v1162_v27 = vsel %vm1149_vm6, %v5314_v26, 0.0 }
 0x2d2   : > { %1163 = vadd.xlane.f32.xlu0 %v1162_v27 }
 0x2d4   : > { %v5316_v28 = vpop.eup %5315 }
 0x2d5   : > { %v1165_v29 = vsel %vm1149_vm6, %v5316_v28, 0.0 }
 0x2d6   : > { %1166 = vadd.xlane.f32.xlu1 %v1165_v29 }
 0x2e7   : > { %1434 = vrot.lane.b32.xlu1 %v1070_v56, %s5378_s23 }
 0x35b   : > { %v1164_v31 = vpop.xlane.xlu0 %1163 }
 0x35c   : > { %5317 = vrcp.f32 %v1164_v31 }
 0x35f   : > { %v1167_v32 = vpop.xlane.xlu1 %1166 }
 0x360   : > { %5319 = vrcp.f32 %v1167_v32 }
 0x363   : > { %v1435_v33 = vpop.permute.xlu1 %1434 }
 0x364   : > { %5056 = vmatmul.mubr.msk.f32.vlgmr.msra.gmra.mxu0 %vm980_vm4, %v1435_v33 }
 0x365   : > { %5065 = vmatprep.mubr.msk.f32.mxu0 %vm5375_vm3, %v5373_v14 }
 0x369   : > { %v5318_v34 = vpop.eup %5317 }
 0x36a   : > { %v1170_v35 = vmul.f32 %v5318_v34, %v5314_v26 }
 0x36c   : > { %5041 = vmatmul.mubr.msk.f32.vlgmr.msra.gmra.mxu1 %vm1188_vm7, %v1170_v35 }
 0x36d   : > { %v5320_v36 = vpop.eup %5319  ;;  %5044 = vmatpush3.msk.msra.mxu1 %vm1192_vm5, %v5537_v57  ;;  %5045 = vmatprep.mubr.msk.f32.mxu1 %vm5375_vm3, %v5373_v14 }
 0x36e   : > { %5048 = vmatprep.subr.mxu1 %v5373_v14  ;;  %v1171_v37 = vmul.f32 %v5320_v36, %v5316_v28 }
 0x370   : > { %5046 = vmatmul.mubr.msk.f32.vlgmr.msra.gmra.mxu1 %vm1188_vm7, %v1171_v37 }
 0x371   : > { %5049 = vmatpush3.xpose.msk.msra.mxu1 %vm980_vm4, %v1359_v23  ;;  %5050 = vmatprep.mubr.msk.f32.mxu1 %vm5375_vm3, %v5373_v14 }
 0x372   : > { %5058 = vmatprep.subr.mxu1 %v5373_v14 }
 0x374   : > { %5051 = vmatmul.mubr.msk.f32.vlgmr.msra.gmra.mxu1 %vm980_vm4, %v1357_v30 }
 0x375   : > { %5060 = vmatprep.mubr.msk.f32.mxu1 %vm5375_vm3, %v5373_v14 }
 0x424   : > { %v1508_v38 = vpop.f32.mrf.mxu0 }
 0x425   : > { %v1513_v39 = vmul.f32 0.17677669, %v1508_v38 }
 0x426   : > { %v5057_v40 = vpop.f32.mrf.mxu0 }
 0x427   : > { %v1517_v41 = vsel %vm1149_vm6, %v1513_v39, -inf }
 0x428   : > { %1518 = vmax.xlane.f32.xlu1 %v1517_v41 }
 0x42c   : > { %v5585_v42 = vpop.f32.mrf.mxu1 }
 0x42e   : > { %v5042_v43 = vpop.f32.mrf.mxu1 }
 0x430   : > { %v1352_v44 = vpop.f32.mrf.mxu1 }
 0x432   : > { %v5047_v45 = vpop.f32.mrf.mxu1 }
 0x434   : > { %v1430_v46 = vpop.f32.mrf.mxu1 }
 0x435   : > { %v1512_v47 = vmul.f32 0.17677669, %v1430_v46 }
 0x436   : > { %v5052_v48 = vpop.f32.mrf.mxu1 }
 0x437   : > { %v1514_v49 = vsel %vm1149_vm6, %v1512_v47, -inf }
 0x438   : > { %1515 = vmax.xlane.f32.xlu0 %v1514_v49 }
 0x4b1   : > { %v1519_v50 = vpop.xlane.xlu1 %1518 }
 0x4b2   : > { %v1521_v51 = vsub.f32 %v1513_v39, %v1519_v50  ;;  %v5624_v39 = vld [vmem:[%s5466_s11] sm:$0x3f] }
 0x4b3   : > { %v1765_v40 = vrot.slane %v5624_v39, %v5511_v19 }
 0x4b4   : > { %v1524_v52 = vmul.f32 1.442695, %v1521_v51 }
 0x4b6   : > { %5321 = vpow2.f32 %v1524_v52 }
 0x4c1   : > { %v1516_v55 = vpop.xlane.xlu0 %1515 }
 0x4c2   : > { %v1520_v56 = vsub.f32 %v1512_v47, %v1516_v55 }
 0x4c3   : > { %v5322_v53 = vpop.eup %5321 }
 0x4c4   : > { %v1529_v54 = vsel %vm1149_vm6, %v5322_v53, 0.0  ;;  %v1522_v58 = vmul.f32 1.442695, %v1520_v56 }
 0x4c5   : > { %1530 = vadd.xlane.f32.xlu0 %v1529_v54 }
 0x4c6   : > { %5323 = vpow2.f32 %v1522_v58 }
 0x4d3   : > { %v5324_v59 = vpop.eup %5323 }
 0x4d4   : > { %v1526_v60 = vsel %vm1149_vm6, %v5324_v59, 0.0 }
 0x4db   : > { %1536 = vrot.lane.b32.xlu0 %v5549_v1, %s5378_s23 }
 0x4fa   : > { %1527 = vadd.xlane.f32.xlu0 %v1526_v60  ;;  %v535_v60 = vld [vmem:[%s5471_s21 + $0x180] sm:$0xff] }
 0x510   : > { %1613 = vrot.lane.b32.xlu0 %v5537_v57, %s5378_s23 }
 0x54e   : > { %v1531_v61 = vpop.xlane.xlu0 %1530 }
 0x54f   : > { %5325 = vrcp.f32 %v1531_v61  ;;  %v543_v61 = vld [vmem:[%s5471_s21 + $0x1c0] sm:$0xff] }
 0x552   : > { %v1537_v62 = vpop.permute.xlu0 %1536 }
 0x553   : > { %5059 = vmatpush3.msk.msra.mxu1 %vm1192_vm5, %v1537_v62  ;;  %v536_v62 = vld [vmem:[%s5471_s21 + $0x188] sm:$0xff] }
 0x554   : > { %5068 = vmatprep.subr.bf16.mxu1 %v5373_v14 }
 0x55c   : > { %v5326_v0 = vpop.eup %5325 }
 0x55d   : > { %v1535_v2 = vmul.f32 %v5326_v0, %v5322_v53  ;;  %v544_v0 = vld [vmem:[%s5471_s21 + $0x1c8] sm:$0xff] }
 0x583   : > { %v1528_v63 = vpop.xlane.xlu0 %1527 }
 0x584   : > { %5327 = vrcp.f32 %v1528_v63  ;;  %v4570_v63 = vcombine.high %v535_v60, %v543_v61 }
 0x587   : > { %v1614_v1 = vpop.permute.xlu0 %1613 }
 0x588   : > { %5064 = vmatpush3.msk.msra.mxu0 %vm1192_vm5, %v1614_v1  ;;  %v4569_v1 = vcombine.low %v535_v60, %v543_v61  ;;  %v521_v60 = vld [vmem:[%s5471_s21 + $0x110] sm:$0xff] }
 0x589   : > { %5066 = vmatmul.mubr.msk.f32.vlgmr.msra.gmra.mxu0 %vm1188_vm7, %v1535_v2  ;;  %v4571_v2 = vcombine.low %v536_v62, %v544_v0  ;;  %2290 = vmatprep.subr.bf16.mxu0 %v4570_v63  ;;  %v529_v61 = vld [vmem:[%s5471_s21 + $0x150] sm:$0xff]  ;;  %v530_v63 = vld [vmem:[%s5471_s21 + $0x158] sm:$0xff] }
 0x58a   : > { %2314 = vmatprep.mubr.bf16.mxu0 %v5372_v4  ;;  %2291 = vmatpush1.bf16.msra.mxu0 %v4569_v1 }
 0x591   : > { %v5328_v57 = vpop.eup %5327 }
 0x592   : > { %v1534_v3 = vmul.f32 %v5328_v57, %v5324_v59  ;;  %v4572_v57 = vcombine.high %v536_v62, %v544_v0  ;;  %v522_v62 = vld [vmem:[%s5471_s21 + $0x118] sm:$0xff] }
 0x594   : > { %5061 = vmatmul.mubr.msk.f32.vlgmr.msra.gmra.mxu1 %vm1188_vm7, %v1534_v3  ;;  %v519_v3 = vld [vmem:[%s5471_s21 + $0x100] sm:$0xff] }
 0x595   : > { %5076 = vmatprep.mubr.msk.bf16.mxu1 %vm5375_vm3, %v5373_v14  ;;  %5069 = vmatpush3.bf16.msra.mxu1 %v5181_v5  ;;  %v527_v5 = vld [vmem:[%s5471_s21 + $0x140] sm:$0xff] }
 0x596   : > { %5070 = vmatprep.subr.bf16.mxu1 %v5373_v14 }
 0x599   : > { %5071 = vmatpush3.bf16.msra.mxu1 %v5182_v7  ;;  %v4554_v7 = vcombine.high %v519_v3, %v527_v5 }
 0x59a   : > { %5072 = vmatprep.subr.bf16.mxu1 %v5373_v14 }
 0x59b   : > { %2292 = vmatprep.subr.bf16.mxu0 %v4554_v7  ;;  %v4559_v7 = vcombine.low %v522_v62, %v530_v63 }
 0x59d   : > { %5073 = vmatpush3.bf16.msra.mxu1 %v5183_v9  ;;  %v4553_v9 = vcombine.low %v519_v3, %v527_v5  ;;  %v506_v3 = vld [vmem:[%s5471_s21 + $0x98] sm:$0xff] }
 0x59e   : > { %5074 = vmatprep.subr.bf16.mxu1 %v5373_v14  ;;  %v514_v5 = vld [vmem:[%s5471_s21 + $0xd8] sm:$0xff] }
 0x59f   : > { %2293 = vmatpush1.bf16.msra.mxu0 %v4553_v9  ;;  %v4544_v9 = vcombine.high %v506_v3, %v514_v5 }
 0x5a1   : > { %5075 = vmatpush3.bf16.msra.mxu1 %v5184_v10 }
 0x5a2   : > { %2333 = vmatprep.subr.bf16.mxu1 %v4572_v57  ;;  %v505_v57 = vld [vmem:[%s5471_s21 + $0x90] sm:$0xff] }
 0x649   : > { %v1686_v6 = vpop.f32.mrf.mxu0 }
 0x64a   : > { %1694 = vrot.lane.b32.xlu1 %v1686_v6, %s5377_s20  ;;  %v520_v6 = vld [vmem:[%s5471_s21 + $0x108] sm:$0xff] }
 0x64b   : > { %v5067_v8 = vpop.f32.mrf.mxu0 }
 0x64c   : > { %v528_v8 = vld [vmem:[%s5471_s21 + $0x148] sm:$0xff] }
 0x64d   : > { %v4555_v10 = vcombine.low %v520_v6, %v528_v8 }
 0x654   : > { %v1609_v13 = vpop.f32.mrf.mxu1 }
 0x655   : > { %1692 = vrot.lane.b32.xlu0 %v1609_v13, %s5377_s20  ;;  %v4556_v13 = vcombine.high %v520_v6, %v528_v8  ;;  %v4557_v6 = vcombine.low %v521_v60, %v529_v61 }
 0x656   : > { %v5062_v15 = vpop.f32.mrf.mxu1 }
 0x657   : > { %v503_v15 = vld [vmem:[%s5471_s21 + $0x80] sm:$0xff] }
 0x6bc   : > { %v1695_v17 = vpop.permute.xlu1 %1694 }
 0x6bd   : > { %v1699_v18 = vsel %vm980_vm4, %v1352_v44, %v1695_v17  ;;  %v511_v17 = vld [vmem:[%s5471_s21 + $0xc0] sm:$0xff] }
 0x6be   : > { %v1718_v20 = vcombine.high %v1699_v18, %v1699_v18  ;;  %v1725_v21 = vrot.slane %v1699_v18, %v5519_v24  ;;  %v504_v18 = vld [vmem:[%s5471_s21 + $0x88] sm:$0xff] }
 0x6c0   : > { %v1732_v26 = vrot.slane %v1718_v20, %v5519_v24  ;;  %v1733_v14 = vcombine.high %v1725_v21, %v1725_v21  ;;  %v4538_v20 = vcombine.high %v503_v15, %v511_v17 }
 0x6c2   : > { %v1751_v31 = vcombine.low %v1733_v14, %v1732_v26  ;;  %2294 = vmatprep.subr.bf16.mxu0 %v4538_v20  ;;  %v487_v14 = vld [vmem:[%s5471_s21] sm:$0xff]  ;;  %v4543_v20 = vcombine.low %v506_v3, %v514_v5  ;;  %v525_v3 = vld [vmem:[%s5471_s21 + $0x130] sm:$0xff] }
 0x6c3   : > { %v533_v5 = vld [vmem:[%s5471_s21 + $0x170] sm:$0xff] }
 0x6c4   : > { %v1758_v36 = vrot.slane %v1751_v31, %v5519_v24 }
 0x6c7   : > { %v1693_v23 = vpop.permute.xlu0 %1692 }
 0x6c8   : > { %v1698_v25 = vsel %vm980_vm4, %v5585_v42, %v1693_v23  ;;  %v4537_v23 = vcombine.low %v503_v15, %v511_v17  ;;  %v490_v15 = vld [vmem:[%s5471_s21 + $0x18] sm:$0xff] }
 0x6c9   : > { %v1702_v27 = vcombine.high %v1698_v25, %v1698_v25  ;;  %v1709_v28 = vrot.slane %v1698_v25, %v5519_v24  ;;  %v498_v17 = vld [vmem:[%s5471_s21 + $0x58] sm:$0xff] }
 0x6ca   : > { %2295 = vmatpush1.bf16.msra.mxu0 %v4537_v23  ;;  %v4528_v23 = vcombine.high %v490_v15, %v498_v17 }
 0x6cb   : > { %v1716_v29 = vrot.slane %v1702_v27, %v5519_v24  ;;  %v1717_v30 = vcombine.high %v1709_v28, %v1709_v28  ;;  %v495_v27 = vld [vmem:[%s5471_s21 + $0x40] sm:$0xff] }
 0x6cc   : > { %v4521_v31 = vcombine.low %v487_v14, %v495_v27 }
 0x6cd   : > { %v1734_v32 = vcombine.low %v1709_v28, %v1717_v30  ;;  %v1735_v33 = vcombine.low %v1716_v29, %v1725_v21  ;;  %v512_v21 = vld [vmem:[%s5471_s21 + $0xc8] sm:$0xff]  ;;  %v4522_v29 = vcombine.high %v487_v14, %v495_v27 }
 0x6ce   : > { %v4539_v25 = vcombine.low %v504_v18, %v512_v21  ;;  %v4540_v26 = vcombine.high %v504_v18, %v512_v21  ;;  %v488_v28 = vld [vmem:[%s5471_s21 + $0x8] sm:$0xff] }
 0x6cf   : > { %v1742_v34 = vrot.slane %v1734_v32, %v5519_v24  ;;  %v1749_v35 = vrot.slane %v1735_v33, %v5519_v24  ;;  %v496_v30 = vld [vmem:[%s5471_s21 + $0x48] sm:$0xff]  ;;  %2296 = vmatprep.subr.bf16.mxu0 %v4522_v29  ;;  %v4527_v29 = vcombine.low %v490_v15, %v498_v17  ;;  %v509_v15 = vld [vmem:[%s5471_s21 + $0xb0] sm:$0xff] }
 0x6d0   : > { %v4523_v32 = vcombine.low %v488_v28, %v496_v30  ;;  %v4524_v33 = vcombine.high %v488_v28, %v496_v30  ;;  %2297 = vmatpush1.bf16.msra.mxu0 %v4521_v31  ;;  %v540_v14 = vld [vmem:[%s5471_s21 + $0x1a8] sm:$0xff]  ;;  %v517_v17 = vld [vmem:[%s5471_s21 + $0xf0] sm:$0xff] }
 0x6d1   : > { %v1750_v37 = vcombine.low %v1742_v34, %v1749_v35  ;;  %v537_v34 = vld [vmem:[%s5471_s21 + $0x190] sm:$0xff]  ;;  %v548_v27 = vld [vmem:[%s5471_s21 + $0x1e8] sm:$0xff] }
 0x6d2   : > { %v545_v35 = vld [vmem:[%s5471_s21 + $0x1d0] sm:$0xff]  ;;  %v4580_v31 = vcombine.high %v540_v14, %v548_v27 }
 0x6d3   : > { %v1761_v38 = vpack.c.bf16 %v1758_v36, %v1750_v37  ;;  %v538_v36 = vld [vmem:[%s5471_s21 + $0x198] sm:$0xff]  ;;  %v4573_v37 = vcombine.low %v537_v34, %v545_v35 }
 0x6d5   : > { %5077 = vmatmul.mubr.msk.bf16.vlgmr.msra.gmra.mxu1 %vm861_vm2, %v1761_v38  ;;  %v4574_v38 = vcombine.high %v537_v34, %v545_v35  ;;  %v524_v34 = vld [vmem:[%s5471_s21 + $0x128] sm:$0xff] }
 0x6d6   : > { %2357 = vmatprep.mubr.bf16.mxu1 %v5372_v4  ;;  %2334 = vmatpush1.bf16.msra.mxu1 %v4571_v2  ;;  %v4558_v2 = vcombine.high %v521_v60, %v529_v61  ;;  %v532_v35 = vld [vmem:[%s5471_s21 + $0x168] sm:$0xff]  ;;  %v541_v60 = vld [vmem:[%s5471_s21 + $0x1b0] sm:$0xff] }
 0x6d7   : > { %2335 = vmatprep.subr.bf16.mxu1 %v4556_v13  ;;  %2376 = vmatprep.subr.bf16.mxu0 %v4574_v38  ;;  %v497_v13 = vld [vmem:[%s5471_s21 + $0x50] sm:$0xff] }
 0x6d8   : > { %v549_v61 = vld [vmem:[%s5471_s21 + $0x1f0] sm:$0xff] }
 0x6da   : > { %2336 = vmatpush1.bf16.msra.mxu1 %v4555_v10  ;;  %v489_v10 = vld [vmem:[%s5471_s21 + $0x10] sm:$0xff] }
 0x6db   : > { %2337 = vmatprep.subr.bf16.mxu1 %v4540_v26  ;;  %v4526_v21 = vcombine.high %v489_v10, %v497_v13  ;;  %v547_v26 = vld [vmem:[%s5471_s21 + $0x1e0] sm:$0xff]  ;;  %v4525_v28 = vcombine.low %v489_v10, %v497_v13  ;;  %v4566_v10 = vcombine.high %v525_v3, %v533_v5 }
 0x6de   : > { %2338 = vmatpush1.bf16.msra.mxu1 %v4539_v25  ;;  %v539_v25 = vld [vmem:[%s5471_s21 + $0x1a0] sm:$0xff] }
 0x6df   : > { %2339 = vmatprep.subr.bf16.mxu1 %v4524_v33  ;;  %v4578_v30 = vcombine.high %v539_v25, %v547_v26  ;;  %v531_v33 = vld [vmem:[%s5471_s21 + $0x160] sm:$0xff] }
 0x6e2   : > { %2340 = vmatpush1.bf16.msra.mxu1 %v4523_v32  ;;  %v523_v32 = vld [vmem:[%s5471_s21 + $0x120] sm:$0xff] }
 0x6e3   : > { %v4562_v38 = vcombine.high %v523_v32, %v531_v33 }
 0x795   : > { %v1827_v41 = vpop.f32.mrf.mxu1 }
 0x796   : > { %v1828_v42 = vadd.f32 %v1827_v41, %v1765_v40 }
 0x797   : > { %v5078_v43 = vpop.f32.mrf.mxu1 }
 0x798   : > { %v1834_v44 = vadd.f32 %v1828_v42, %v5499_v11 }
 0x799   : > { %v1830_v45 = vpop.f32.mrf.mxu1 }
 0x79a   : > { %v1831_v46 = vadd.f32 %v1830_v45, %v1765_v40  ;;  %v1836_v47 = vsel %vm861_vm2, %v1834_v44, 0.0  ;;  %v546_v40 = vld [vmem:[%s5471_s21 + $0x1d8] sm:$0xff] }
 0x79b   : > { %1837 = vadd.xlane.f32.xlu0 %v1836_v47  ;;  %v5079_v48 = vpop.f32.mrf.mxu1  ;;  %v4575_v41 = vcombine.low %v538_v36, %v546_v40  ;;  %v4576_v42 = vcombine.high %v538_v36, %v546_v40  ;;  %v4577_v36 = vcombine.low %v539_v25, %v547_v26  ;;  %v4564_v40 = vcombine.high %v524_v34, %v532_v35 }
 0x79c   : > { %v1835_v49 = vadd.f32 %v1831_v46, %v5501_v12  ;;  %v4550_v25 = vcombine.high %v509_v15, %v517_v17 }
 0x79d   : > { %2419 = vmatprep.subr.bf16.mxu1 %v4576_v42  ;;  %v515_v42 = vld [vmem:[%s5471_s21 + $0xe0] sm:$0xff] }
 0x79e   : > { %v1840_v50 = vsel %vm1839_vm8, %v1835_v49, 0.0 }
 0x79f   : > { %1841 = vadd.xlane.f32.xlu1 %v1840_v50 }
 0x824   : > { %v1838_v51 = vpop.xlane.xlu0 %1837 }
 0x825   : > { %v1844_v52 = vmul.f32 0.015625, %v1838_v51  ;;  %v5666_v51 = vsub.s32 3, %v5508_v16 }
 0x827   : > { %v5632_v53 = vsub.f32 %v1834_v44, %v1844_v52 }
 0x828   : > { %v1842_v11 = vpop.xlane.xlu1 %1841 }
 0x829   : > { %v1845_v54 = vmul.f32 0.015625, %v1842_v11  ;;  %v1848_v55 = vmul.f32 %v5632_v53, %v5632_v53 }
 0x82b   : > { %v5636_v56 = vsub.f32 %v1835_v49, %v1845_v54  ;;  %v1850_v58 = vsel %vm861_vm2, %v1848_v55, 0.0  ;;  %v5663_v49 = vsub.s32 2, %v5508_v16  ;;  %v1873_v55 = vrot.slane %v5624_v39, %v5666_v51 }
 0x82c   : > { %1851 = vadd.xlane.f32.xlu0 %v1850_v58 }
 0x82d   : > { %v1849_v12 = vmul.f32 %v5636_v56, %v5636_v56  ;;  %v1867_v52 = vrot.slane %v5624_v39, %v5663_v49  ;;  %v4560_v39 = vcombine.high %v522_v62, %v530_v63  ;;  %v542_v62 = vld [vmem:[%s5471_s21 + $0x1b8] sm:$0xff] }
 0x82e   : > { %v550_v63 = vld [vmem:[%s5471_s21 + $0x1f8] sm:$0xff] }
 0x82f   : > { %v1853_v59 = vsel %vm1839_vm8, %v1849_v12, 0.0 }
 0x830   : > { %1854 = vadd.xlane.f32.xlu0 %v1853_v59 }
 0x8b5   : > { %v1852_v43 = vpop.xlane.xlu0 %1851 }
 0x8b6   : > { %v1856_v44 = vmul.f32 0.015625, %v1852_v43  ;;  %v508_v43 = vld [vmem:[%s5471_s21 + $0xa8] sm:$0xff] }
 0x8b8   : > { %v1858_v45 = vadd.f32 1e-05, %v1856_v44  ;;  %v516_v44 = vld [vmem:[%s5471_s21 + $0xe8] sm:$0xff] }
 0x8b9   : > { %v1855_v46 = vpop.xlane.xlu0 %1854 }
 0x8ba   : > { %5329 = vrsqrt.f32 %v1858_v45  ;;  %v1857_v47 = vmul.f32 0.015625, %v1855_v46  ;;  %v4561_v45 = vcombine.low %v523_v32, %v531_v33  ;;  %v4563_v46 = vcombine.low %v524_v34, %v532_v35 }
 0x8bc   : > { %v1859_v48 = vadd.f32 1e-05, %v1857_v47 }
 0x8be   : > { %5331 = vrsqrt.f32 %v1859_v48  ;;  %v4548_v48 = vcombine.high %v508_v43, %v516_v44 }
 0x8c7   : > { %v5330_v50 = vpop.eup %5329 }
 0x8c8   : > { %v1862_v11 = vmul.f32 %v5330_v50, %v5632_v53  ;;  %v491_v50 = vld [vmem:[%s5471_s21 + $0x20] sm:$0xff] }
 0x8ca   : > { %v1868_v58 = vmul.f32 %v1867_v52, %v1862_v11  ;;  %v492_v11 = vld [vmem:[%s5471_s21 + $0x28] sm:$0xff] }
 0x8cb   : > { %v5332_v54 = vpop.eup %5331 }
 0x8cc   : > { %v1863_v12 = vmul.f32 %v5332_v54, %v5636_v56  ;;  %v5678_v0 = vadd.f32 %v1873_v55, %v1868_v58  ;;  %v513_v56 = vld [vmem:[%s5471_s21 + $0xd0] sm:$0xff]  ;;  %v500_v54 = vld [vmem:[%s5471_s21 + $0x68] sm:$0xff]  ;;  %v4547_v58 = vcombine.low %v508_v43, %v516_v44 }
 0x8cd   : > { %v4542_v8 = vcombine.high %v505_v57, %v513_v56  ;;  %v4541_v18 = vcombine.low %v505_v57, %v513_v56  ;;  %v4582_v57 = vcombine.high %v541_v60, %v549_v61  ;;  %v4584_v56 = vcombine.high %v542_v62, %v550_v63  ;;  %v5192_v43 = vld [vmem:[%s5481_s2 + $0xb0] sm:$0xff]   ;;  %v5193_v44 = vld [vmem:[%s5481_s2 + $0x68] sm:$0xff]  }
 0x8ce   : > { %v1869_v59 = vmul.f32 %v1867_v52, %v1863_v12  ;;  %v499_v52 = vld [vmem:[%s5471_s21 + $0x60] sm:$0xff] }
 0x8cf   : > { %v4530_v12 = vcombine.high %v491_v50, %v499_v52 }
 0x8d0   : > { %v5680_v1 = vadd.f32 %v1873_v55, %v1869_v59  ;;  %v4532_v59 = vcombine.high %v492_v11, %v500_v54 }
 0x8d2   : > { %v5684_v53 = vpack.c.bf16 %v5680_v1, %v5678_v0 }
 0x8d4   : > { %4585 = vmatmul.mubr.msk.bf16.vlgmr.msra.gmra.mxu0 %vm861_vm2, %v5684_v53  ;;  %4586 = vmatmul.mubr.msk.bf16.vlgmr.msra.gmra.mxu1 %vm861_vm2, %v5684_v53 }
 0x8d5   : > { %2377 = vmatpush1.bf16.msra.mxu0 %v4573_v37  ;;  %2420 = vmatpush1.bf16.msra.mxu1 %v4575_v41  ;;  %v4579_v37 = vcombine.low %v540_v14, %v548_v27  ;;  %v507_v41 = vld [vmem:[%s5471_s21 + $0xa0] sm:$0xff]  ;;  %v493_v14 = vld [vmem:[%s5471_s21 + $0x30] sm:$0xff] }
 0x8d6   : > { %2378 = vmatprep.subr.bf16.mxu0 %v4558_v2  ;;  %2421 = vmatprep.subr.bf16.mxu1 %v4560_v39  ;;  %v4546_v47 = vcombine.high %v507_v41, %v515_v42  ;;  %v4545_v55 = vcombine.low %v507_v41, %v515_v42  ;;  %v4529_v2 = vcombine.low %v491_v50, %v499_v52  ;;  %v501_v27 = vld [vmem:[%s5471_s21 + $0x70] sm:$0xff]  ;;  %v5199_v50 = vld [vmem:[%s5481_s2 + $0x20] sm:$0xff]  }
 0x8d7   : > { %2400 = vmatprep.mubr.bf16.mxu0 %v5372_v4  ;;  %2443 = vmatprep.mubr.bf16.mxu1 %v5372_v4  ;;  %v4531_v39 = vcombine.low %v492_v11, %v500_v54  ;;  %v4534_v32 = vcombine.high %v493_v14, %v501_v27  ;;  %v4533_v34 = vcombine.low %v493_v14, %v501_v27  ;;  %v5190_v41 = vld [vmem:[%s5481_s2 + $0xf0] sm:$0xff]   ;;  %v5200_v52 = vld [vmem:[%s5481_s2 + $0xa0] sm:$0xff]   ;;  %v5201_v11 = vld [vmem:[%s5481_s2 + $0x58] sm:$0xff]  }
 0x8d8   : > { %v5191_v42 = vld [vmem:[%s5481_s2 + $0x30] sm:$0xff]   ;;  %v5202_v54 = vld [vmem:[%s5481_s2 + $0xd8] sm:$0xff]  }
 0x8d9   : > { %2379 = vmatpush1.bf16.msra.mxu0 %v4557_v6  ;;  %2422 = vmatpush1.bf16.msra.mxu1 %v4559_v7  ;;  %v526_v6 = vld [vmem:[%s5471_s21 + $0x138] sm:$0xff] }
 0x8da   : > { %2380 = vmatprep.subr.bf16.mxu0 %v4542_v8  ;;  %2423 = vmatprep.subr.bf16.mxu1 %v4544_v9  ;;  %v534_v7 = vld [vmem:[%s5471_s21 + $0x178] sm:$0xff]  ;;  %v4581_v8 = vcombine.low %v541_v60, %v549_v61  ;;  %v4583_v9 = vcombine.low %v542_v62, %v550_v63  ;;  %v5207_v60 = vld [vmem:[%s5481_s2 + $0x10] sm:$0xff]   ;;  %v5209_v62 = vld [vmem:[%s5481_s2 + $0x48] sm:$0xff]  }
 0x8db   : > { %v4568_v13 = vcombine.high %v526_v6, %v534_v7  ;;  %v5208_v61 = vld [vmem:[%s5481_s2 + $0x90] sm:$0xff]   ;;  %v5210_v63 = vld [vmem:[%s5481_s2 + $0xc8] sm:$0xff]  }
 0x8dd   : > { %2381 = vmatpush1.bf16.msra.mxu0 %v4541_v18  ;;  %2424 = vmatpush1.bf16.msra.mxu1 %v4543_v20  ;;  %v510_v18 = vld [vmem:[%s5471_s21 + $0xb8] sm:$0xff] }
 0x8de   : > { %2382 = vmatprep.subr.bf16.mxu0 %v4526_v21  ;;  %2425 = vmatprep.subr.bf16.mxu1 %v4528_v23  ;;  %v518_v20 = vld [vmem:[%s5471_s21 + $0xf8] sm:$0xff]  ;;  %v4565_v21 = vcombine.low %v525_v3, %v533_v5  ;;  %v4567_v23 = vcombine.low %v526_v6, %v534_v7  ;;  %v5215_v3 = vld [vmem:[%s5481_s2] sm:$0xff]  }
 0x8df   : > { %v4552_v26 = vcombine.high %v510_v18, %v518_v20  ;;  %v5216_v5 = vld [vmem:[%s5481_s2 + $0x80] sm:$0xff]   ;;  %v5217_v6 = vld [vmem:[%s5481_s2 + $0x178] sm:$0xff]  }
 0x8e0   : > { %v5218_v7 = vld [vmem:[%s5481_s2 + $0x1f8] sm:$0xff]  }
 0x8e1   : > { %2383 = vmatpush1.bf16.msra.mxu0 %v4525_v28  ;;  %2426 = vmatpush1.bf16.msra.mxu1 %v4527_v29  ;;  %v494_v28 = vld [vmem:[%s5471_s21 + $0x38] sm:$0xff] }
 0x8e2   : > { %2462 = vmatprep.subr.bf16.mxu0 %v4578_v30  ;;  %2505 = vmatprep.subr.bf16.mxu1 %v4580_v31  ;;  %v502_v29 = vld [vmem:[%s5471_s21 + $0x78] sm:$0xff]  ;;  %v4549_v30 = vcombine.low %v509_v15, %v517_v17  ;;  %v4551_v31 = vcombine.low %v510_v18, %v518_v20 }
 0x8e3   : > { %v4536_v33 = vcombine.high %v494_v28, %v502_v29  ;;  %v4535_v35 = vcombine.low %v494_v28, %v502_v29 }
 0x8e4   : > { %4587 = vmatmul.mubr.msk.bf16.vlgmr.msra.gmra.mxu0 %vm861_vm2, %v5684_v53  ;;  %4588 = vmatmul.mubr.msk.bf16.vlgmr.msra.gmra.mxu1 %vm861_vm2, %v5684_v53 }
 0x8e5   : > { %2463 = vmatpush1.bf16.msra.mxu0 %v4577_v36  ;;  %2506 = vmatpush1.bf16.msra.mxu1 %v4579_v37  ;;  %v5186_v36 = vld [vmem:[%s5481_s2 + $0xf8] sm:$0xff]  }
 0x8e6   : > { %2464 = vmatprep.subr.bf16.mxu0 %v4562_v38  ;;  %2507 = vmatprep.subr.bf16.mxu1 %v4564_v40  ;;  %v5187_v37 = vld [vmem:[%s5481_s2 + $0x38] sm:$0xff]   ;;  %v5189_v40 = vld [vmem:[%s5481_s2 + $0x70] sm:$0xff]  }
 0x8e7   : > { %2486 = vmatprep.mubr.bf16.mxu0 %v5372_v4  ;;  %2529 = vmatprep.mubr.bf16.mxu1 %v5372_v4  ;;  %v5188_v38 = vld [vmem:[%s5481_s2 + $0xb8] sm:$0xff]  }
 0x8e9   : > { %2465 = vmatpush1.bf16.msra.mxu0 %v4561_v45  ;;  %2508 = vmatpush1.bf16.msra.mxu1 %v4563_v46  ;;  %v5194_v45 = vld [vmem:[%s5481_s2 + $0xe8] sm:$0xff]  }
 0x8ea   : > { %2466 = vmatprep.subr.bf16.mxu0 %v4546_v47  ;;  %2509 = vmatprep.subr.bf16.mxu1 %v4548_v48  ;;  %v5195_v46 = vld [vmem:[%s5481_s2 + $0x28] sm:$0xff]   ;;  %v5198_v48 = vld [vmem:[%s5481_s2 + $0xe0] sm:$0xff]  }
 0x8eb   : > { %v5196_v47 = vld [vmem:[%s5481_s2 + $0xa8] sm:$0xff]  }
 0x8ed   : > { %2467 = vmatpush1.bf16.msra.mxu0 %v4545_v55  ;;  %2510 = vmatpush1.bf16.msra.mxu1 %v4547_v58  ;;  %v5203_v55 = vld [vmem:[%s5481_s2 + $0x18] sm:$0xff]  }
 0x8ee   : > { %2468 = vmatprep.subr.bf16.mxu0 %v4530_v12  ;;  %2511 = vmatprep.subr.bf16.mxu1 %v4532_v59  ;;  %v5204_v58 = vld [vmem:[%s5481_s2 + $0x98] sm:$0xff]   ;;  %v5205_v12 = vld [vmem:[%s5481_s2 + $0x50] sm:$0xff]  }
 0x8ef   : > { %v5206_v59 = vld [vmem:[%s5481_s2 + $0xd0] sm:$0xff]  }
 0x8f1   : > { %2469 = vmatpush1.bf16.msra.mxu0 %v4529_v2  ;;  %2512 = vmatpush1.bf16.msra.mxu1 %v4531_v39  ;;  %v5211_v2 = vld [vmem:[%s5481_s2 + $0x8] sm:$0xff]  }
 0x8f2   : > { %2548 = vmatprep.subr.bf16.mxu0 %v4582_v57  ;;  %2591 = vmatprep.subr.bf16.mxu1 %v4584_v56  ;;  %v5212_v39 = vld [vmem:[%s5481_s2 + $0x88] sm:$0xff]   ;;  %v5213_v57 = vld [vmem:[%s5481_s2 + $0x40] sm:$0xff]  }
 0x8f3   : > { %v5214_v56 = vld [vmem:[%s5481_s2 + $0xc0] sm:$0xff]  }
 0x8f4   : > { %4589 = vmatmul.mubr.msk.bf16.vlgmr.msra.gmra.mxu0 %vm861_vm2, %v5684_v53  ;;  %4590 = vmatmul.mubr.msk.bf16.vlgmr.msra.gmra.mxu1 %vm861_vm2, %v5684_v53 }
 0x8f5   : > { %2549 = vmatpush1.bf16.msra.mxu0 %v4581_v8  ;;  %2592 = vmatpush1.bf16.msra.mxu1 %v4583_v9  ;;  %v1905_v8 = vsub.s32 6, %v5508_v16  ;;  %v5784_v9 = vld [vmem:[%s5476_s1 + $0x8] sm:$0xff] }
 0x8f6   : > { %2550 = vmatprep.subr.bf16.mxu0 %v4566_v10  ;;  %2593 = vmatprep.subr.bf16.mxu1 %v4568_v13  ;;  %v5792_v13 = vld [vmem:[%s5476_s1] sm:$0xff] }
 0x8f7   : > { %2572 = vmatprep.mubr.bf16.mxu0 %v5372_v4  ;;  %2615 = vmatprep.mubr.bf16.mxu1 %v5372_v4  ;;  %v5185_v4 = vld [vmem:[%s5481_s2 + $0x78] sm:$0xff]   ;;  %v5789_v10 = vrot.slane %v5784_v9, %v1905_v8  ;;  %v1886_v18 = vrot.slane %v5792_v13, %v5515_v22  ;;  %v1894_v20 = vrot.slane %v5792_v13, %v5666_v51 }
 0x8f9   : > { %2551 = vmatpush1.bf16.msra.mxu0 %v4565_v21  ;;  %2594 = vmatpush1.bf16.msra.mxu1 %v4567_v23  ;;  %v1882_v21 = vrot.slane %v5792_v13, %v5511_v19  ;;  %v1890_v23 = vrot.slane %v5792_v13, %v5663_v49 }
 0x8fa   : > { %2552 = vmatprep.subr.bf16.mxu0 %v4550_v25  ;;  %2595 = vmatprep.subr.bf16.mxu1 %v4552_v26 }
 0x8fd   : > { %2553 = vmatpush1.bf16.msra.mxu0 %v4549_v30  ;;  %2596 = vmatpush1.bf16.msra.mxu1 %v4551_v31 }
 0x8fe   : > { %2554 = vmatprep.subr.bf16.mxu0 %v4534_v32  ;;  %2597 = vmatprep.subr.bf16.mxu1 %v4536_v33 }
 0x901   : > { %2555 = vmatpush1.bf16.msra.mxu0 %v4533_v34  ;;  %2598 = vmatpush1.bf16.msra.mxu1 %v4535_v35 }
 0x902   : > { %4822 = vmatprep.subr.bf16.mxu0 %v5185_v4  ;;  %4844 = vmatprep.subr.bf16.mxu1 %v5186_v36 }
 0x904   : > { %4591 = vmatmul.mubr.msk.bf16.vlgmr.msra.gmra.mxu0 %vm861_vm2, %v5684_v53  ;;  %4592 = vmatmul.mubr.msk.bf16.vlgmr.msra.gmra.mxu1 %vm861_vm2, %v5684_v53  ;;  %v5197_v53 = vld [vmem:[%s5481_s2 + $0x60] sm:$0xff]  }
 0x905   : > { %4823 = vmatpush3.bf16.msra.mxu0 %v5187_v37  ;;  %4845 = vmatpush3.bf16.msra.mxu1 %v5188_v38 }
 0x906   : > { %4824 = vmatprep.subr.bf16.mxu0 %v5189_v40  ;;  %4846 = vmatprep.subr.bf16.mxu1 %v5190_v41 }
 0x909   : > { %4825 = vmatpush3.bf16.msra.mxu0 %v5191_v42  ;;  %4847 = vmatpush3.bf16.msra.mxu1 %v5192_v43 }
 0x90a   : > { %4826 = vmatprep.subr.bf16.mxu0 %v5193_v44  ;;  %4848 = vmatprep.subr.bf16.mxu1 %v5194_v45 }
 0x90d   : > { %4827 = vmatpush3.bf16.msra.mxu0 %v5195_v46  ;;  %4849 = vmatpush3.bf16.msra.mxu1 %v5196_v47 }
 0x90e   : > { %4828 = vmatprep.subr.bf16.mxu0 %v5197_v53  ;;  %4850 = vmatprep.subr.bf16.mxu1 %v5198_v48  ;;  %v5219_v53 = vld [vmem:[%s5481_s2 + $0x138] sm:$0xff]  }
 0x90f   : > { %v5220_v48 = vld [vmem:[%s5481_s2 + $0x1b8] sm:$0xff]  }
 0x911   : > { %4829 = vmatpush3.bf16.msra.mxu0 %v5199_v50  ;;  %4851 = vmatpush3.bf16.msra.mxu1 %v5200_v52 }
 0x912   : > { %4830 = vmatprep.subr.bf16.mxu0 %v5201_v11  ;;  %4852 = vmatprep.subr.bf16.mxu1 %v5202_v54  ;;  %v5221_v11 = vld [vmem:[%s5481_s2 + $0x170] sm:$0xff]  }
 0x913   : > { %v5222_v54 = vld [vmem:[%s5481_s2 + $0x1f0] sm:$0xff]  }
 0x915   : > { %4831 = vmatpush3.bf16.msra.mxu0 %v5203_v55  ;;  %4853 = vmatpush3.bf16.msra.mxu1 %v5204_v58  ;;  %v5807_v55 = vsub.s32 5, %v5508_v16  ;;  %v1909_v58 = vsub.s32 7, %v5508_v16 }
 0x916   : > { %4832 = vmatprep.subr.bf16.mxu0 %v5205_v12  ;;  %4854 = vmatprep.subr.bf16.mxu1 %v5206_v59  ;;  %v5223_v12 = vld [vmem:[%s5481_s2 + $0x130] sm:$0xff]  }
 0x917   : > { %v5224_v59 = vld [vmem:[%s5481_s2 + $0x1b0] sm:$0xff]  }
 0x919   : > { %4833 = vmatpush3.bf16.msra.mxu0 %v5207_v60  ;;  %4855 = vmatpush3.bf16.msra.mxu1 %v5208_v61 }
 0x91a   : > { %4834 = vmatprep.subr.bf16.mxu0 %v5209_v62  ;;  %4856 = vmatprep.subr.bf16.mxu1 %v5210_v63  ;;  %v5225_v62 = vld [vmem:[%s5481_s2 + $0x168] sm:$0xff]  }
 0x91b   : > { %v5226_v63 = vld [vmem:[%s5481_s2 + $0x1e8] sm:$0xff]  }
 0x91d   : > { %4835 = vmatpush3.bf16.msra.mxu0 %v5211_v2  ;;  %4857 = vmatpush3.bf16.msra.mxu1 %v5212_v39  ;;  %v1902_v2 = vrot.slane %v5792_v13, %v5807_v55  ;;  %v1910_v39 = vrot.slane %v5792_v13, %v1909_v58 }
 0x91e   : > { %4836 = vmatprep.subr.bf16.mxu0 %v5213_v57  ;;  %4858 = vmatprep.subr.bf16.mxu1 %v5214_v56 }
 0x921   : > { %4837 = vmatpush3.bf16.msra.mxu0 %v5215_v3  ;;  %4859 = vmatpush3.bf16.msra.mxu1 %v5216_v5  ;;  %v5227_v3 = vld [vmem:[%s5481_s2 + $0x128] sm:$0xff]  }
 0x922   : > { %4866 = vmatprep.subr.bf16.mxu0 %v5217_v6  ;;  %4888 = vmatprep.subr.bf16.mxu1 %v5218_v7  ;;  %v5228_v5 = vld [vmem:[%s5481_s2 + $0x1a8] sm:$0xff]  }
 0x994   : > { %v2316_v15 = vpop.f32.mrf.mxu0  ;;  %v2359_v17 = vpop.f32.mrf.mxu1 }
 0x995   : > { %v2317_v32 = vadd.f32 %v2316_v15, %v1882_v21  ;;  %v2360_v33 = vadd.f32 %v2359_v17, %v1890_v23  ;;  %v5229_v15 = vld [vmem:[%s5481_s2 + $0x160] sm:$0xff]  }
 0x996   : > { %v2318_v25 = vpop.f32.mrf.mxu0  ;;  %v2361_v26 = vpop.f32.mrf.mxu1  ;;  %v5230_v17 = vld [vmem:[%s5481_s2 + $0x1e0] sm:$0xff]  }
 0x997   : > { %v2319_v28 = vadd.f32 %v2318_v25, %v1886_v18  ;;  %v2362_v29 = vadd.f32 %v2361_v26, %v1894_v20  ;;  %v2626_v44 = vmax.f32 %v2317_v32, 0.0  ;;  %v2628_v45 = vmax.f32 %v2360_v33, 0.0 }
 0x998   : > { %v2320_v14 = vpop.f32.mrf.mxu0  ;;  %v2363_v27 = vpop.f32.mrf.mxu1 }
 0x999   : > { %v2321_v30 = vadd.f32 %v2320_v14, %v1882_v21  ;;  %v2364_v31 = vadd.f32 %v2363_v27, %v1890_v23  ;;  %v2627_v40 = vmax.f32 %v2319_v28, 0.0  ;;  %v2629_v41 = vmax.f32 %v2362_v29, 0.0  ;;  %v5231_v14 = vld [vmem:[%s5481_s2 + $0x120] sm:$0xff]   ;;  %v5233_v28 = vld [vmem:[%s5481_s2 + $0x158] sm:$0xff]  }
 0x99a   : > { %v2322_v34 = vpop.f32.mrf.mxu0  ;;  %v2365_v35 = vpop.f32.mrf.mxu1  ;;  %v5232_v27 = vld [vmem:[%s5481_s2 + $0x1a0] sm:$0xff]   ;;  %v5234_v29 = vld [vmem:[%s5481_s2 + $0x1d8] sm:$0xff]  }
 0x99b   : > { %v2323_v4 = vadd.f32 %v2322_v34, %v1886_v18  ;;  %v2366_v36 = vadd.f32 %v2365_v35, %v1894_v20  ;;  %v2642_v37 = vmax.f32 %v2321_v30, 0.0  ;;  %v2644_v38 = vmax.f32 %v2364_v31, 0.0 }
 0x99d   : > { %v2643_v42 = vmax.f32 %v2323_v4, 0.0  ;;  %v2645_v43 = vmax.f32 %v2366_v36, 0.0  ;;  %v2658_v50 = vpack.c.bf16 %v2642_v37, %v2626_v44  ;;  %v2660_v52 = vpack.c.bf16 %v2644_v38, %v2628_v45  ;;  %v5235_v4 = vld [vmem:[%s5481_s2 + $0x118] sm:$0xff]   ;;  %v5237_v37 = vld [vmem:[%s5481_s2 + $0x150] sm:$0xff]   ;;  %v5241_v45 = vld [vmem:[%s5481_s2 + $0x148] sm:$0xff]  }
 0x99e   : > { %v5236_v36 = vld [vmem:[%s5481_s2 + $0x198] sm:$0xff]   ;;  %v5238_v38 = vld [vmem:[%s5481_s2 + $0x1d0] sm:$0xff]  }
 0x99f   : > { %v2659_v46 = vpack.c.bf16 %v2643_v42, %v2627_v40  ;;  %v2661_v47 = vpack.c.bf16 %v2645_v43, %v2629_v41  ;;  %v5836_v40 = vsub.s32 4, %v5508_v16  ;;  %v5239_v41 = vld [vmem:[%s5481_s2 + $0x110] sm:$0xff]   ;;  %v5281_v16 = vld [vmem:[%s5481_s2 + $0x378] sm:$0xff]  }
 0x9a0   : > { %v5240_v42 = vld [vmem:[%s5481_s2 + $0x190] sm:$0xff]  }
 0x9a1   : > { %3478 = vmatprep.mubr.bf16.mxu0 %v2659_v46  ;;  %3519 = vmatprep.mubr.bf16.mxu1 %v2661_v47  ;;  %v5242_v46 = vld [vmem:[%s5481_s2 + $0x1c8] sm:$0xff]   ;;  %v1898_v47 = vrot.slane %v5792_v13, %v5836_v40 }
 0x9a2   : > { %3479 = vmatmul.mubr.bf16.vlgmr.msra.gmra.mxu0 %v2658_v50  ;;  %3520 = vmatmul.mubr.bf16.vlgmr.msra.gmra.mxu1 %v2660_v52  ;;  %v1918_v52 = vrot.slane %v5784_v9, %v5515_v22 }
 0x9a3   : > { %4867 = vmatpush3.bf16.msra.mxu0 %v5219_v53  ;;  %4889 = vmatpush3.bf16.msra.mxu1 %v5220_v48  ;;  %v1906_v53 = vrot.slane %v5792_v13, %v1905_v8  ;;  %v5245_v13 = vld [vmem:[%s5481_s2 + $0x140] sm:$0xff]  }
 0x9a4   : > { %v5812_v60 = vpop.f32.mrf.mxu0  ;;  %v5814_v61 = vpop.f32.mrf.mxu1  ;;  %4868 = vmatprep.subr.bf16.mxu0 %v5221_v11  ;;  %4890 = vmatprep.subr.bf16.mxu1 %v5222_v54  ;;  %v5243_v11 = vld [vmem:[%s5481_s2 + $0x108] sm:$0xff]  }
 0x9a5   : > { %v5244_v54 = vld [vmem:[%s5481_s2 + $0x188] sm:$0xff]  }
 0x9a6   : > { %v2404_v57 = vpop.f32.mrf.mxu0  ;;  %v2447_v56 = vpop.f32.mrf.mxu1 }
 0x9a7   : > { %4869 = vmatpush3.bf16.msra.mxu0 %v5223_v12  ;;  %4891 = vmatpush3.bf16.msra.mxu1 %v5224_v59  ;;  %v2405_v18 = vadd.f32 %v2404_v57, %v1902_v2  ;;  %v2448_v20 = vadd.f32 %v2447_v56, %v1910_v39  ;;  %v2446_v57 = vadd.f32 %v5814_v61, %v1906_v53 }
 0x9a8   : > { %v2406_v6 = vpop.f32.mrf.mxu0  ;;  %v2449_v7 = vpop.f32.mrf.mxu1  ;;  %4870 = vmatprep.subr.bf16.mxu0 %v5225_v62  ;;  %4892 = vmatprep.subr.bf16.mxu1 %v5226_v63  ;;  %v1926_v62 = vrot.slane %v5784_v9, %v5666_v51 }
 0x9a9   : > { %v2631_v30 = vmax.f32 %v2405_v18, 0.0  ;;  %v2633_v31 = vmax.f32 %v2448_v20, 0.0  ;;  %v2407_v12 = vadd.f32 %v2406_v6, %v1898_v47  ;;  %v2450_v59 = vadd.f32 %v2449_v7, %v1906_v53  ;;  %v5247_v7 = vld [vmem:[%s5481_s2 + $0x100] sm:$0xff]  }
 0x9aa   : > { %v2408_v21 = vpop.f32.mrf.mxu0  ;;  %v2451_v23 = vpop.f32.mrf.mxu1  ;;  %v5263_v53 = vld [vmem:[%s5481_s2 + $0x220] sm:$0xff]  }
 0x9ab   : > { %v2409_v25 = vadd.f32 %v2408_v21, %v1902_v2  ;;  %v2452_v26 = vadd.f32 %v2451_v23, %v1910_v39  ;;  %4871 = vmatpush3.bf16.msra.mxu0 %v5227_v3  ;;  %4893 = vmatpush3.bf16.msra.mxu1 %v5228_v5  ;;  %v5246_v2 = vld [vmem:[%s5481_s2 + $0x1c0] sm:$0xff]   ;;  %v2403_v39 = vadd.f32 %v5812_v60, %v1898_v47  ;;  %v2648_v18 = vmax.f32 %v2450_v59, 0.0  ;;  %v5249_v60 = vld [vmem:[%s5481_s2 + $0x278] sm:$0xff]  }
 0x9ac   : > { %4872 = vmatprep.subr.bf16.mxu0 %v5229_v15  ;;  %4894 = vmatprep.subr.bf16.mxu1 %v5230_v17  ;;  %v5248_v15 = vld [vmem:[%s5481_s2 + $0x180] sm:$0xff]   ;;  %v2646_v17 = vmax.f32 %v2407_v12, 0.0  ;;  %v5250_v21 = vld [vmem:[%s5481_s2 + $0x2f8] sm:$0xff]  }
 0x9ad   : > { %v2647_v32 = vmax.f32 %v2409_v25, 0.0  ;;  %v2649_v33 = vmax.f32 %v2452_v26, 0.0  ;;  %v2630_v23 = vmax.f32 %v2403_v39, 0.0  ;;  %v2632_v25 = vmax.f32 %v2446_v57, 0.0  ;;  %v5267_v12 = vld [vmem:[%s5481_s2 + $0x218] sm:$0xff]   ;;  %v5271_v57 = vld [vmem:[%s5481_s2 + $0x210] sm:$0xff]  }
 0x9af   : > { %v2663_v34 = vpack.c.bf16 %v2647_v32, %v2631_v30  ;;  %v2665_v35 = vpack.c.bf16 %v2649_v33, %v2633_v31  ;;  %4873 = vmatpush3.bf16.msra.mxu0 %v5231_v14  ;;  %4895 = vmatpush3.bf16.msra.mxu1 %v5232_v27  ;;  %v5251_v27 = vld [vmem:[%s5481_s2 + $0x238] sm:$0xff]   ;;  %v5253_v33 = vld [vmem:[%s5481_s2 + $0x270] sm:$0xff]  }
 0x9b0   : > { %4874 = vmatprep.subr.bf16.mxu0 %v5233_v28  ;;  %4896 = vmatprep.subr.bf16.mxu1 %v5234_v29  ;;  %v2662_v28 = vpack.c.bf16 %v2646_v17, %v2630_v23  ;;  %v2664_v29 = vpack.c.bf16 %v2648_v18, %v2632_v25  ;;  %v5252_v31 = vld [vmem:[%s5481_s2 + $0x2b8] sm:$0xff]   ;;  %v5275_v17 = vld [vmem:[%s5481_s2 + $0x208] sm:$0xff]   ;;  %v5278_v23 = vld [vmem:[%s5481_s2 + $0x2c0] sm:$0xff]  }
 0x9b1   : > { %3560 = vmatprep.mubr.bf16.mxu0 %v2663_v34  ;;  %3601 = vmatprep.mubr.bf16.mxu1 %v2665_v35  ;;  %v5254_v34 = vld [vmem:[%s5481_s2 + $0x2f0] sm:$0xff]  }
 0x9b3   : > { %4875 = vmatpush3.bf16.msra.mxu0 %v5235_v4  ;;  %4897 = vmatpush3.bf16.msra.mxu1 %v5236_v36  ;;  %v5255_v4 = vld [vmem:[%s5481_s2 + $0x230] sm:$0xff]  }
 0x9b4   : > { %v5840_v43 = vpop.f32.mrf.mxu0  ;;  %v5842_v44 = vpop.f32.mrf.mxu1  ;;  %4876 = vmatprep.subr.bf16.mxu0 %v5237_v37  ;;  %4898 = vmatprep.subr.bf16.mxu1 %v5238_v38  ;;  %v5256_v36 = vld [vmem:[%s5481_s2 + $0x2b0] sm:$0xff]   ;;  %v5257_v37 = vld [vmem:[%s5481_s2 + $0x268] sm:$0xff]  }
 0x9b5   : > { %v5258_v38 = vld [vmem:[%s5481_s2 + $0x2e8] sm:$0xff]  }
 0x9b6   : > { %v2490_v48 = vpop.f32.mrf.mxu0  ;;  %v2533_v50 = vpop.f32.mrf.mxu1 }
 0x9b7   : > { %4877 = vmatpush3.bf16.msra.mxu0 %v5239_v41  ;;  %4899 = vmatpush3.bf16.msra.mxu1 %v5240_v42  ;;  %v2491_v5 = vadd.f32 %v2490_v48, %v1918_v52  ;;  %v2534_v20 = vadd.f32 %v2533_v50, %v1926_v62  ;;  %v5259_v41 = vld [vmem:[%s5481_s2 + $0x228] sm:$0xff]   ;;  %v5264_v50 = vld [vmem:[%s5481_s2 + $0x2a0] sm:$0xff]  }
 0x9b8   : > { %v5857_v63 = vpop.f32.mrf.mxu0  ;;  %v5859_v8 = vpop.f32.mrf.mxu1  ;;  %4878 = vmatprep.subr.bf16.mxu0 %v5241_v45  ;;  %4900 = vmatprep.subr.bf16.mxu1 %v5242_v46  ;;  %v5260_v42 = vld [vmem:[%s5481_s2 + $0x2a8] sm:$0xff]   ;;  %v5261_v45 = vld [vmem:[%s5481_s2 + $0x260] sm:$0xff]  }
 0x9b9   : > { %v2635_v14 = vmax.f32 %v2491_v5, 0.0  ;;  %v2637_v30 = vmax.f32 %v2534_v20, 0.0  ;;  %v5262_v46 = vld [vmem:[%s5481_s2 + $0x2e0] sm:$0xff]   ;;  %v5273_v5 = vld [vmem:[%s5481_s2 + $0x248] sm:$0xff]   ;;  %v1934_v20 = vrot.slane %v5784_v9, %v5807_v55 }
 0x9ba   : > { %v2494_v56 = vpop.f32.mrf.mxu0  ;;  %v2537_v3 = vpop.f32.mrf.mxu1 }
 0x9bb   : > { %v2495_v51 = vadd.f32 %v2494_v56, %v1918_v52  ;;  %v2538_v6 = vadd.f32 %v2537_v3, %v1926_v62  ;;  %4879 = vmatpush3.bf16.msra.mxu0 %v5243_v11  ;;  %4901 = vmatpush3.bf16.msra.mxu1 %v5244_v54  ;;  %v5265_v52 = vld [vmem:[%s5481_s2 + $0x258] sm:$0xff]   ;;  %v5272_v3 = vld [vmem:[%s5481_s2 + $0x290] sm:$0xff]  }
 0x9bc   : > { %4880 = vmatprep.subr.bf16.mxu0 %v5245_v13  ;;  %4902 = vmatprep.subr.bf16.mxu1 %v5246_v2  ;;  %v5266_v11 = vld [vmem:[%s5481_s2 + $0x2d8] sm:$0xff]   ;;  %v5269_v13 = vld [vmem:[%s5481_s2 + $0x250] sm:$0xff]  }
 0x9bd   : > { %v2651_v61 = vmax.f32 %v2495_v51, 0.0  ;;  %v2653_v26 = vmax.f32 %v2538_v6, 0.0  ;;  %v5268_v62 = vld [vmem:[%s5481_s2 + $0x298] sm:$0xff]   ;;  %v5270_v2 = vld [vmem:[%s5481_s2 + $0x2d0] sm:$0xff]   ;;  %v5274_v51 = vld [vmem:[%s5481_s2 + $0x2c8] sm:$0xff]   ;;  %v1914_v6 = vrot.slane %v5784_v9, %v5511_v19 }
 0x9bf   : > { %4881 = vmatpush3.bf16.msra.mxu0 %v5247_v7  ;;  %4903 = vmatpush3.bf16.msra.mxu1 %v5248_v15  ;;  %v2667_v32 = vpack.c.bf16 %v2651_v61, %v2635_v14  ;;  %v2669_v35 = vpack.c.bf16 %v2653_v26, %v2637_v30  ;;  %v1922_v7 = vrot.slane %v5784_v9, %v5663_v49  ;;  %v5277_v61 = vld [vmem:[%s5481_s2 + $0x240] sm:$0xff]  }
 0x9c0   : > { %4910 = vmatprep.subr.bf16.mxu0 %v5249_v60  ;;  %4932 = vmatprep.subr.bf16.mxu1 %v5250_v21  ;;  %v2493_v18 = vadd.f32 %v5857_v63, %v1914_v6  ;;  %v5276_v21 = vld [vmem:[%s5481_s2 + $0x288] sm:$0xff]   ;;  %v1942_v49 = vrot.slane %v5784_v9, %v1909_v58  ;;  %v2489_v63 = vadd.f32 %v5840_v43, %v1914_v6  ;;  %v5301_v6 = vld [vmem:[%s5481_s2 + $0x350] sm:$0xff]  }
 0x9c1   : > { %v2536_v19 = vadd.f32 %v5859_v8, %v1922_v7  ;;  %v2532_v26 = vadd.f32 %v5842_v44, %v1922_v7  ;;  %v5280_v8 = vld [vmem:[%s5481_s2 + $0x280] sm:$0xff]   ;;  %v5302_v7 = vld [vmem:[%s5481_s2 + $0x3d0] sm:$0xff]  }
 0x9c2   : > { %3561 = vmatmul.mubr.bf16.vlgmr.msra.gmra.mxu0 %v2662_v28  ;;  %3602 = vmatmul.mubr.bf16.vlgmr.msra.gmra.mxu1 %v2664_v29  ;;  %v2650_v28 = vmax.f32 %v2493_v18, 0.0  ;;  %v2634_v43 = vmax.f32 %v2489_v63, 0.0  ;;  %v5305_v18 = vld [vmem:[%s5481_s2 + $0x348] sm:$0xff]   ;;  %v5310_v63 = vld [vmem:[%s5481_s2 + $0x3c0] sm:$0xff]  }
 0x9c3   : > { %4911 = vmatpush3.bf16.msra.mxu0 %v5251_v27  ;;  %3642 = vmatprep.mubr.bf16.mxu0 %v2667_v32  ;;  %v5279_v27 = vld [vmem:[%s5481_s2 + $0x200] sm:$0xff]   ;;  %v2652_v58 = vmax.f32 %v2536_v19, 0.0  ;;  %v2636_v44 = vmax.f32 %v2532_v26, 0.0  ;;  %v5308_v19 = vld [vmem:[%s5481_s2 + $0x388] sm:$0xff]  }
 0x9c4   : > { %4933 = vmatpush3.bf16.msra.mxu1 %v5252_v31  ;;  %3683 = vmatprep.mubr.bf16.mxu1 %v2669_v35  ;;  %v5881_v47 = vpop.f32.mrf.mxu0  ;;  %v5884_v48 = vpop.f32.mrf.mxu1  ;;  %v5282_v31 = vld [vmem:[%s5481_s2 + $0x3f8] sm:$0xff]   ;;  %v2666_v35 = vpack.c.bf16 %v2650_v28, %v2634_v43 }
 0x9c5   : > { %4912 = vmatprep.subr.bf16.mxu0 %v5253_v33  ;;  %4934 = vmatprep.subr.bf16.mxu1 %v5254_v34  ;;  %v5283_v34 = vld [vmem:[%s5481_s2 + $0x338] sm:$0xff]   ;;  %v2618_v26 = vadd.f32 %v5884_v48, %v5789_v10 }
 0x9c6   : > { %v2576_v54 = vpop.f32.mrf.mxu0  ;;  %v2619_v59 = vpop.f32.mrf.mxu1 }
 0x9c7   : > { %4913 = vmatpush3.bf16.msra.mxu0 %v5255_v4  ;;  %v2577_v29 = vadd.f32 %v2576_v54, %v1934_v20  ;;  %v2620_v30 = vadd.f32 %v2619_v59, %v1942_v49  ;;  %v5291_v54 = vld [vmem:[%s5481_s2 + $0x328] sm:$0xff]   ;;  %v5293_v59 = vld [vmem:[%s5481_s2 + $0x360] sm:$0xff]  }
 0x9c8   : > { %4935 = vmatpush3.bf16.msra.mxu1 %v5256_v36  ;;  %4914 = vmatprep.subr.bf16.mxu0 %v5257_v37  ;;  %v5893_v39 = vpop.f32.mrf.mxu0  ;;  %v5896_v56 = vpop.f32.mrf.mxu1  ;;  %v5284_v36 = vld [vmem:[%s5481_s2 + $0x3b8] sm:$0xff]   ;;  %v2668_v37 = vpack.c.bf16 %v2652_v58, %v2636_v44 }
 0x9c9   : > { %4936 = vmatprep.subr.bf16.mxu1 %v5258_v38  ;;  %v2639_v4 = vmax.f32 %v2577_v29, 0.0  ;;  %v2641_v38 = vmax.f32 %v2620_v30, 0.0  ;;  %v2640_v29 = vmax.f32 %v2618_v26, 0.0 }
 0x9ca   : > { %v2580_v15 = vpop.f32.mrf.mxu0  ;;  %v2623_v60 = vpop.f32.mrf.mxu1 }
 0x9cb   : > { %4915 = vmatpush3.bf16.msra.mxu0 %v5259_v41  ;;  %v2581_v25 = vadd.f32 %v2580_v15, %v1934_v20  ;;  %v2624_v14 = vadd.f32 %v2623_v60, %v1942_v49  ;;  %v5285_v41 = vld [vmem:[%s5481_s2 + $0x370] sm:$0xff]   ;;  %v5306_v20 = vld [vmem:[%s5481_s2 + $0x3c8] sm:$0xff]   ;;  %v1930_v60 = vrot.slane %v5784_v9, %v5836_v40  ;;  %v5309_v49 = vld [vmem:[%s5481_s2 + $0x340] sm:$0xff]  }
 0x9cc   : > { %4937 = vmatpush3.bf16.msra.mxu1 %v5260_v42  ;;  %4916 = vmatprep.subr.bf16.mxu0 %v5261_v45  ;;  %v5286_v45 = vld [vmem:[%s5481_s2 + $0x3f0] sm:$0xff]   ;;  %v5311_v9 = vld [vmem:[%s5481_s2 + $0x300] sm:$0xff]  }
 0x9cd   : > { %4938 = vmatprep.subr.bf16.mxu1 %v5262_v46  ;;  %v2655_v32 = vmax.f32 %v2581_v25, 0.0  ;;  %v2657_v33 = vmax.f32 %v2624_v14, 0.0  ;;  %v5303_v15 = vld [vmem:[%s5481_s2 + $0x310] sm:$0xff]   ;;  %v2575_v25 = vadd.f32 %v5881_v47, %v1930_v60 }
 0x9cf   : > { %4917 = vmatpush3.bf16.msra.mxu0 %v5263_v53  ;;  %v2671_v42 = vpack.c.bf16 %v2655_v32, %v2639_v4  ;;  %v2673_v46 = vpack.c.bf16 %v2657_v33, %v2641_v38  ;;  %v5287_v53 = vld [vmem:[%s5481_s2 + $0x330] sm:$0xff]   ;;  %v2638_v28 = vmax.f32 %v2575_v25, 0.0 }
 0x9d0   : > { %4939 = vmatpush3.bf16.msra.mxu1 %v5264_v50  ;;  %4918 = vmatprep.subr.bf16.mxu0 %v5265_v52  ;;  %v5288_v50 = vld [vmem:[%s5481_s2 + $0x3b0] sm:$0xff]   ;;  %v5289_v52 = vld [vmem:[%s5481_s2 + $0x368] sm:$0xff]  }
 0x9d1   : > { %4940 = vmatprep.subr.bf16.mxu1 %v5266_v11  ;;  %v5290_v11 = vld [vmem:[%s5481_s2 + $0x3e8] sm:$0xff]  }
 0x9d3   : > { %4919 = vmatpush3.bf16.msra.mxu0 %v5267_v12  ;;  %v5292_v12 = vld [vmem:[%s5481_s2 + $0x3a8] sm:$0xff]  }
 0x9d4   : > { %4941 = vmatpush3.bf16.msra.mxu1 %v5268_v62  ;;  %4920 = vmatprep.subr.bf16.mxu0 %v5269_v13  ;;  %v5294_v62 = vld [vmem:[%s5481_s2 + $0x3e0] sm:$0xff]  }
 0x9d5   : > { %4942 = vmatprep.subr.bf16.mxu1 %v5270_v2  ;;  %v5295_v13 = vld [vmem:[%s5481_s2 + $0x320] sm:$0xff]  }
 0x9d6   : > { %v5296_v2 = vld [vmem:[%s5481_s2 + $0x3a0] sm:$0xff]  }
 0x9d7   : > { %4921 = vmatpush3.bf16.msra.mxu0 %v5271_v57  ;;  %v5297_v57 = vld [vmem:[%s5481_s2 + $0x358] sm:$0xff]  }
 0x9d8   : > { %4943 = vmatpush3.bf16.msra.mxu1 %v5272_v3  ;;  %4922 = vmatprep.subr.bf16.mxu0 %v5273_v5  ;;  %v5298_v3 = vld [vmem:[%s5481_s2 + $0x3d8] sm:$0xff]  }
 0x9d9   : > { %4944 = vmatprep.subr.bf16.mxu1 %v5274_v51  ;;  %v5299_v5 = vld [vmem:[%s5481_s2 + $0x318] sm:$0xff]  }
 0x9da   : > { %v5300_v51 = vld [vmem:[%s5481_s2 + $0x398] sm:$0xff]  }
 0x9db   : > { %4923 = vmatpush3.bf16.msra.mxu0 %v5275_v17  ;;  %v5304_v17 = vld [vmem:[%s5481_s2 + $0x390] sm:$0xff]  }
 0x9dc   : > { %4945 = vmatpush3.bf16.msra.mxu1 %v5276_v21  ;;  %4924 = vmatprep.subr.bf16.mxu0 %v5277_v61  ;;  %v5307_v21 = vld [vmem:[%s5481_s2 + $0x308] sm:$0xff]   ;;  %v2579_v61 = vadd.f32 %v5893_v39, %v1930_v60  ;;  %v5312_v39 = vld [vmem:[%s5481_s2 + $0x380] sm:$0xff]  }
 0x9dd   : > { %4946 = vmatprep.subr.bf16.mxu1 %v5278_v23  ;;  %v2622_v23 = vadd.f32 %v5896_v56, %v5789_v10 }
 0x9de   : > { %v2654_v14 = vmax.f32 %v2579_v61, 0.0 }
 0x9df   : > { %4925 = vmatpush3.bf16.msra.mxu0 %v5279_v27  ;;  %v2656_v27 = vmax.f32 %v2622_v23, 0.0 }
 0x9e0   : > { %4947 = vmatpush3.bf16.msra.mxu1 %v5280_v8  ;;  %4954 = vmatprep.subr.bf16.mxu0 %v5281_v16  ;;  %v2670_v8 = vpack.c.bf16 %v2654_v14, %v2638_v28 }
 0x9e1   : > { %4976 = vmatprep.subr.bf16.mxu1 %v5282_v31  ;;  %v2672_v56 = vpack.c.bf16 %v2656_v27, %v2640_v29 }
 0x9e2   : > { %3643 = vmatmul.mubr.bf16.vlgmr.msra.gmra.mxu0 %v2666_v35 }
 0x9e3   : > { %3684 = vmatmul.mubr.bf16.vlgmr.msra.gmra.mxu1 %v2668_v37  ;;  %4955 = vmatpush3.bf16.msra.mxu0 %v5283_v34  ;;  %v5961_v37 = vld [vmem:[%s5466_s11] sm:$0x3f] }
 0x9e4   : > { %3724 = vmatprep.mubr.bf16.mxu0 %v2671_v42  ;;  %4977 = vmatpush3.bf16.msra.mxu1 %v5284_v36  ;;  %v2677_v38 = vrot.slane %v5961_v37, %v5515_v22 }
 0x9e5   : > { %3765 = vmatprep.mubr.bf16.mxu1 %v2673_v46  ;;  %4956 = vmatprep.subr.bf16.mxu0 %v5285_v41 }
 0x9e6   : > { %4978 = vmatprep.subr.bf16.mxu1 %v5286_v45 }
 0x9e7   : > { %4957 = vmatpush3.bf16.msra.mxu0 %v5287_v53 }
 0x9e8   : > { %4979 = vmatpush3.bf16.msra.mxu1 %v5288_v50  ;;  %4958 = vmatprep.subr.bf16.mxu0 %v5289_v52 }
 0x9e9   : > { %4980 = vmatprep.subr.bf16.mxu1 %v5290_v11 }
 0x9eb   : > { %4959 = vmatpush3.bf16.msra.mxu0 %v5291_v54 }
 0x9ec   : > { %4981 = vmatpush3.bf16.msra.mxu1 %v5292_v12  ;;  %4960 = vmatprep.subr.bf16.mxu0 %v5293_v59 }
 0x9ed   : > { %4982 = vmatprep.subr.bf16.mxu1 %v5294_v62 }
 0x9ef   : > { %4961 = vmatpush3.bf16.msra.mxu0 %v5295_v13 }
 0x9f0   : > { %4983 = vmatpush3.bf16.msra.mxu1 %v5296_v2  ;;  %4962 = vmatprep.subr.bf16.mxu0 %v5297_v57 }
 0x9f1   : > { %4984 = vmatprep.subr.bf16.mxu1 %v5298_v3 }
 0x9f3   : > { %4963 = vmatpush3.bf16.msra.mxu0 %v5299_v5 }
 0x9f4   : > { %4985 = vmatpush3.bf16.msra.mxu1 %v5300_v51  ;;  %4964 = vmatprep.subr.bf16.mxu0 %v5301_v6 }
 0x9f5   : > { %4986 = vmatprep.subr.bf16.mxu1 %v5302_v7 }
 0x9f7   : > { %4965 = vmatpush3.bf16.msra.mxu0 %v5303_v15 }
 0x9f8   : > { %4987 = vmatpush3.bf16.msra.mxu1 %v5304_v17  ;;  %4966 = vmatprep.subr.bf16.mxu0 %v5305_v18 }
 0x9f9   : > { %4988 = vmatprep.subr.bf16.mxu1 %v5306_v20 }
 0x9fb   : > { %4967 = vmatpush3.bf16.msra.mxu0 %v5307_v21 }
 0x9fc   : > { %4989 = vmatpush3.bf16.msra.mxu1 %v5308_v19  ;;  %4968 = vmatprep.subr.bf16.mxu0 %v5309_v49 }
 0x9fd   : > { %4990 = vmatprep.subr.bf16.mxu1 %v5310_v63 }
 0x9ff   : > { %4969 = vmatpush3.bf16.msra.mxu0 %v5311_v9 }
 0xa00   : > { %4991 = vmatpush3.bf16.msra.mxu1 %v5312_v39 }
 0xa02   : > { %3725 = vmatmul.mubr.bf16.vlgmr.msra.gmra.mxu0 %v2670_v8 }
 0xa03   : > { %3766 = vmatmul.mubr.bf16.vlgmr.msra.gmra.mxu1 %v2672_v56 }
 0xa62   : > { %v4838_v47 = vpop.f32.mrf.mxu0  ;;  %v4860_v16 = vpop.f32.mrf.mxu1 }
 0xa64   : > { %v4839_v10 = vpop.f32.mrf.mxu0  ;;  %v4861_v48 = vpop.f32.mrf.mxu1 }
 0xa65   : > { %v4840_v41 = vadd.f32 %v4839_v10, %v4838_v47  ;;  %v4862_v11 = vadd.f32 %v4861_v48, %v4860_v16 }
 0xa66   : > { %v4841_v58 = vpop.f32.mrf.mxu0  ;;  %v4863_v30 = vpop.f32.mrf.mxu1 }
 0xa67   : > { %v3481_v46 = vadd.f32 %v4840_v41, %v2677_v38 }
 0xa68   : > { %v4842_v31 = vpop.f32.mrf.mxu0  ;;  %v4864_v32 = vpop.f32.mrf.mxu1 }
 0xa69   : > { %v4843_v53 = vadd.f32 %v4842_v31, %v4841_v58  ;;  %v3522_v12 = vadd.f32 %v4862_v11, %v3481_v46  ;;  %v4865_v2 = vadd.f32 %v4864_v32, %v4863_v30 }
 0xa6b   : > { %v3484_v59 = vadd.f32 %v4843_v53, %v2677_v38 }
 0xa6d   : > { %v3525_v5 = vadd.f32 %v4865_v2, %v3484_v59 }
 0xa82   : > { %v4882_v43 = vpop.f32.mrf.mxu0  ;;  %v4904_v44 = vpop.f32.mrf.mxu1 }
 0xa84   : > { %v4883_v33 = vpop.f32.mrf.mxu0  ;;  %v4905_v34 = vpop.f32.mrf.mxu1 }
 0xa85   : > { %v4884_v54 = vadd.f32 %v4883_v33, %v4882_v43  ;;  %v4906_v51 = vadd.f32 %v4905_v34, %v4904_v44 }
 0xa86   : > { %v4885_v35 = vpop.f32.mrf.mxu0  ;;  %v4907_v4 = vpop.f32.mrf.mxu1 }
 0xa87   : > { %v3563_v57 = vadd.f32 %v4884_v54, %v3522_v12  ;;  %v3805_v12 = vrot.slane %v5961_v37, %v5836_v40 }
 0xa88   : > { %v4886_v36 = vpop.f32.mrf.mxu0  ;;  %v4908_v45 = vpop.f32.mrf.mxu1 }
 0xa89   : > { %v4887_v3 = vadd.f32 %v4886_v36, %v4885_v35  ;;  %v3604_v15 = vadd.f32 %v4906_v51, %v3563_v57  ;;  %v4909_v18 = vadd.f32 %v4908_v45, %v4907_v4 }
 0xa8b   : > { %v3566_v17 = vadd.f32 %v4887_v3, %v3525_v5 }
 0xa8d   : > { %v3607_v19 = vadd.f32 %v4909_v18, %v3566_v17 }
 0xaa2   : > { %v4926_v42 = vpop.f32.mrf.mxu0 }
 0xaa3   : > { %v4948_v50 = vpop.f32.mrf.mxu1 }
 0xaa4   : > { %v4927_v52 = vpop.f32.mrf.mxu0 }
 0xaa5   : > { %v4949_v62 = vpop.f32.mrf.mxu1  ;;  %v4928_v6 = vadd.f32 %v4927_v52, %v4926_v42 }
 0xaa6   : > { %v4929_v13 = vpop.f32.mrf.mxu0  ;;  %v4950_v49 = vadd.f32 %v4949_v62, %v4948_v50  ;;  %v3811_v62 = vrot.slane %v5961_v37, %v5807_v55 }
 0xaa7   : > { %v4951_v22 = vpop.f32.mrf.mxu1  ;;  %v3645_v20 = vadd.f32 %v4928_v6, %v3604_v15 }
 0xaa8   : > { %v4930_v7 = vpop.f32.mrf.mxu0 }
 0xaa9   : > { %v4931_v60 = vadd.f32 %v4930_v7, %v4929_v13  ;;  %v4952_v21 = vpop.f32.mrf.mxu1  ;;  %v3686_v25 = vadd.f32 %v4950_v49, %v3645_v20 }
 0xaaa   : > { %v4953_v27 = vadd.f32 %v4952_v21, %v4951_v22 }
 0xaab   : > { %v3648_v26 = vadd.f32 %v4931_v60, %v3607_v19 }
 0xaad   : > { %v3689_v47 = vadd.f32 %v4953_v27, %v3648_v26 }
 0xac2   : > { %v4970_v61 = vpop.f32.mrf.mxu0 }
 0xac3   : > { %v4992_v23 = vpop.f32.mrf.mxu1 }
 0xac4   : > { %v4971_v63 = vpop.f32.mrf.mxu0 }
 0xac5   : > { %v4972_v9 = vadd.f32 %v4971_v63, %v4970_v61  ;;  %v4993_v14 = vpop.f32.mrf.mxu1 }
 0xac6   : > { %v4973_v39 = vpop.f32.mrf.mxu0  ;;  %v4994_v29 = vadd.f32 %v4993_v14, %v4992_v23 }
 0xac7   : > { %v3727_v28 = vadd.f32 %v4972_v9, %v3686_v25  ;;  %v4995_v8 = vpop.f32.mrf.mxu1 }
 0xac8   : > { %v4974_v56 = vpop.f32.mrf.mxu0 }
 0xac9   : > { %v3768_v16 = vadd.f32 %v4994_v29, %v3727_v28  ;;  %v4975_v10 = vadd.f32 %v4974_v56, %v4973_v39  ;;  %v4996_v48 = vpop.f32.mrf.mxu1 }
 0xaca   : > { %v4997_v30 = vadd.f32 %v4996_v48, %v4995_v8 }
 0xacb   : > { %v3730_v58 = vadd.f32 %v4975_v10, %v3689_v47  ;;  %v3774_v31 = vadd.f32 %v3768_v16, %v5678_v0 }
 0xacd   : > { %v3771_v43 = vadd.f32 %v4997_v30, %v3730_v58  ;;  %v3776_v32 = vsel %vm861_vm2, %v3774_v31, 0.0 }
 0xace   : > { %3777 = vadd.xlane.f32.xlu0 %v3776_v32 }
 0xacf   : > { %v3775_v44 = vadd.f32 %v3771_v43, %v5680_v1 }
 0xad1   : > { %v3779_v33 = vsel %vm1839_vm8, %v3775_v44, 0.0 }
 0xad2   : > { %3780 = vadd.xlane.f32.xlu0 %v3779_v33 }
 0xb57   : > { %v3778_v34 = vpop.xlane.xlu0 %3777 }
 0xb58   : > { %v3782_v35 = vmul.f32 0.015625, %v3778_v34 }
 0xb5a   : > { %v3784_v4 = vsub.f32 %v3774_v31, %v3782_v35 }
 0xb5b   : > { %v3781_v36 = vpop.xlane.xlu0 %3780 }
 0xb5c   : > { %v3783_v38 = vmul.f32 0.015625, %v3781_v36  ;;  %v3786_v41 = vmul.f32 %v3784_v4, %v3784_v4 }
 0xb5e   : > { %v3785_v42 = vsub.f32 %v3775_v44, %v3783_v38  ;;  %v3788_v45 = vsel %vm861_vm2, %v3786_v41, 0.0 }
 0xb5f   : > { %3789 = vadd.xlane.f32.xlu0 %v3788_v45 }
 0xb60   : > { %v3787_v0 = vmul.f32 %v3785_v42, %v3785_v42 }
 0xb62   : > { %v3791_v46 = vsel %vm1839_vm8, %v3787_v0, 0.0 }
 0xb63   : > { %3792 = vadd.xlane.f32.xlu1 %v3791_v46 }
 0xbe8   : > { %v3790_v53 = vpop.xlane.xlu0 %3789 }
 0xbe9   : > { %v3794_v50 = vmul.f32 0.015625, %v3790_v53 }
 0xbeb   : > { %v3796_v1 = vadd.f32 1e-05, %v3794_v50 }
 0xbec   : > { %v3793_v52 = vpop.xlane.xlu1 %3792 }
 0xbed   : > { %5333 = vrsqrt.f32 %v3796_v1  ;;  %v3795_v11 = vmul.f32 0.015625, %v3793_v52 }
 0xbef   : > { %v3797_v54 = vadd.f32 1e-05, %v3795_v11 }
 0xbf1   : > { %5335 = vrsqrt.f32 %v3797_v54 }
 0xbfa   : > { %v5334_v59 = vpop.eup %5333 }
 0xbfb   : > { %v3800_v13 = vmul.f32 %v5334_v59, %v3784_v4 }
 0xbfd   : > { %v3806_v2 = vmul.f32 %v3805_v12, %v3800_v13 }
 0xbfe   : > { %v5336_v57 = vpop.eup %5335 }
 0xbff   : > { %v3812_v3 = vadd.f32 %v3811_v62, %v3806_v2  ;;  %v3801_v5 = vmul.f32 %v5336_v57, %v3785_v42 }
 0xc01   : > { %3814 = vst.msk [vmem:[#allocation2] sm:$0xff] %vm861_vm2, %v3812_v3  ;;  %v3807_v51 = vmul.f32 %v3805_v12, %v3801_v5  ;;  %3819 = sbr.rel (%p4721_p5) target bundleno = 3482 (0xd9a), region = 68 }
 0xc03   : > { %v3813_v6 = vadd.f32 %v3811_v62, %v3807_v51 }
 0xc05   : > { %3815 = vst.msk [vmem:[#allocation2 + $0x8] sm:$0xf] %vm1839_vm8, %v3813_v6 }
 0xc06   : > { %v5338_v40 = vld [vmem:[%s6130_s8 + $0x18] sm:$0xff]   ;;  %v3822_v22 = vcombine.high %v3812_v3, %v3812_v3  ;;  %v3829_v55 = vrot.slane %v3812_v3, %v5519_v24  ;;  %v5379_v37 = vmov 0.0   ;;  %v5340_v15 = vld [vmem:[%s6130_s8 + $0x10] sm:$0xff]   ;;  %vm5380_vm9 = vmmov 0   ;;  %v5342_v61 = vld [vmem:[%s6130_s8 + $0x8] sm:$0xff]  }
 0xc07   : > { %5080 = vmatprep.subr.bf16.mxu0 %v5379_v37  ;;  %5092 = vmatprep.subr.bf16.mxu1 %v5379_v37  ;;  %v5339_v7 = vld [vmem:[%s6130_s8 + $0x38] sm:$0xff]   ;;  %v5341_v20 = vld [vmem:[%s6130_s8 + $0x30] sm:$0xff]   ;;  %v5343_v49 = vld [vmem:[%s6130_s8 + $0x28] sm:$0xff]   ;;  %vm3871_vm10 = vcmask 1041409   ;;  %v3845_v9 = vrot.slane %v3813_v6, %v5519_v24  ;;  %vm4363_vm11 = vcmask 1041408   ;;  %vm4373_vm12 = vcmask 1024  }
 0xc08   : > { %5081 = vmatpush3.bf16.msra.mxu0 %v5338_v40  ;;  %5088 = vmatprep.mubr.msk.bf16.mxu0 %vm5380_vm9, %v5379_v37  ;;  %v5993_v17 = vrot.slane %v3822_v22, %v5519_v24  ;;  %v3856_v18 = vpack.c.bf16 %v3829_v55, %v3829_v55  ;;  %v5344_v25 = vld [vmem:[%s6130_s8] sm:$0xff]   ;;  %v3837_v27 = vcombine.high %v3829_v55, %v3829_v55  ;;  %v5346_v24 = vld [vmem:[%s6130_s8 + $0x58] sm:$0xff]   ;;  %v5348_v10 = vld [vmem:[%s6130_s8 + $0x50] sm:$0xff]  }
 0xc09   : > { %5093 = vmatpush3.bf16.msra.mxu1 %v5339_v7  ;;  %5082 = vmatprep.subr.bf16.mxu0 %v5379_v37  ;;  %v5345_v14 = vld [vmem:[%s6130_s8 + $0x20] sm:$0xff]   ;;  %v4027_v56 = vpack.c.bf16 %v3845_v9, %v3845_v9  ;;  %v5347_v47 = vld [vmem:[%s6130_s8 + $0x78] sm:$0xff]   ;;  %v5349_v58 = vld [vmem:[%s6130_s8 + $0x70] sm:$0xff]   ;;  %v3846_v35 = vcombine.high %v3845_v9, %v3845_v9 }
 0xc0a   : > { %5094 = vmatprep.subr.bf16.mxu1 %v5379_v37  ;;  %5100 = vmatprep.mubr.msk.bf16.mxu1 %vm5380_vm9, %v5379_v37  ;;  %v3838_v60 = vcombine.high %v5993_v17, %v5993_v17  ;;  %v3868_v21 = vunpack.c.l.b16 %v3856_v18  ;;  %v4026_v16 = vpack.c.bf16 %v3837_v27, %v3837_v27  ;;  %v5350_v31 = vld [vmem:[%s6130_s8 + $0x48] sm:$0xff]   ;;  %v5352_v33 = vld [vmem:[%s6130_s8 + $0x40] sm:$0xff]   ;;  %v5354_v42 = vld [vmem:[%s6130_s8 + $0x98] sm:$0xff]   ;;  %v4192_v46 = vpack.c.bf16 %v5993_v17, %v5993_v17 }
 0xc0b   : > { %v4040_v48 = vunpack.c.l.b16 %v4027_v56  ;;  %v5351_v32 = vld [vmem:[%s6130_s8 + $0x68] sm:$0xff]   ;;  %v5353_v4 = vld [vmem:[%s6130_s8 + $0x60] sm:$0xff]   ;;  %v4193_v45 = vpack.c.bf16 %v3846_v35, %v3846_v35  ;;  %v5355_v0 = vld [vmem:[%s6130_s8 + $0xb8] sm:$0xff]  }
 0xc0c   : > { %5083 = vmatpush3.bf16.msra.mxu0 %v5340_v15  ;;  %v3857_v19 = vpack.c.bf16 %v3838_v60, %v3838_v60  ;;  %v3955_v23 = vrot.slane %v3868_v21, 1  ;;  %v4039_v30 = vunpack.c.l.b16 %v4026_v16  ;;  %v5356_v53 = vld [vmem:[%s6130_s8 + $0x90] sm:$0xff]   ;;  %v4205_v52 = vunpack.c.l.b16 %v4192_v46  ;;  %v5358_v11 = vld [vmem:[%s6130_s8 + $0x88] sm:$0xff]   ;;  %v5360_v62 = vld [vmem:[%s6130_s8 + $0x80] sm:$0xff]  }
 0xc0d   : > { %5095 = vmatpush3.bf16.msra.mxu1 %v5341_v20  ;;  %5084 = vmatprep.subr.bf16.mxu0 %v5379_v37  ;;  %v4041_v43 = vrot.slane %v4040_v48, 7  ;;  %v4206_v50 = vunpack.c.l.b16 %v4193_v45  ;;  %v5357_v1 = vld [vmem:[%s6130_s8 + $0xb0] sm:$0xff]   ;;  %v5359_v12 = vld [vmem:[%s6130_s8 + $0xa8] sm:$0xff]   ;;  %v5361_v2 = vld [vmem:[%s6130_s8 + $0xa0] sm:$0xff]  }
 0xc0e   : > { %5096 = vmatprep.subr.bf16.mxu1 %v5379_v37  ;;  %v3869_v63 = vunpack.c.l.b16 %v3857_v19  ;;  %v4121_v44 = vrot.slane %v4039_v30, 1  ;;  %v4287_v59 = vrot.slane %v4205_v52, 1 }
 0xc0f   : > { %v4042_v34 = vsel %vm3871_vm10, %v4041_v43, %v4039_v30  ;;  %v4207_v54 = vrot.slane %v4206_v50, 7  ;;  %v4794_v30 = vld [vmem:[%s6131_s9 + $0x2] ss:$0 sm:$0xff] }
 0xc10   : > { %5085 = vmatpush3.bf16.msra.mxu0 %v5342_v61  ;;  %v3870_v26 = vrot.slane %v3869_v63, 7  ;;  %v3956_v39 = vsel %vm3871_vm10, %v3869_v63, %v3955_v23  ;;  %v4122_v36 = vsel %vm3871_vm10, %v4040_v48, %v4121_v44  ;;  %v4043_v38 = vpack.c.b16 %v4042_v34, %v4042_v34 }
 0xc11   : > { %5097 = vmatpush3.bf16.msra.mxu1 %v5343_v49  ;;  %5086 = vmatprep.subr.bf16.mxu0 %v5379_v37  ;;  %v3957_v8 = vpack.c.b16 %v3956_v39, %v3956_v39  ;;  %v4123_v41 = vpack.c.b16 %v4122_v36, %v4122_v36  ;;  %v4208_v13 = vsel %vm3871_vm10, %v4207_v54, %v4205_v52 }
 0xc12   : > { %5098 = vmatprep.subr.bf16.mxu1 %v5379_v37  ;;  %v3872_v28 = vsel %vm3871_vm10, %v3870_v26, %v3868_v21  ;;  %v4288_v57 = vsel %vm3871_vm10, %v4206_v50, %v4287_v59  ;;  %v4209_v3 = vpack.c.b16 %v4208_v13, %v4208_v13 }
 0xc13   : > { %v3873_v29 = vpack.c.b16 %v3872_v28, %v3872_v28  ;;  %v4289_v5 = vpack.c.b16 %v4288_v57, %v4288_v57 }
 0xc14   : > { %5087 = vmatpush3.bf16.msra.mxu0 %v5344_v25 }
 0xc15   : > { %5099 = vmatpush3.bf16.msra.mxu1 %v5345_v14  ;;  %5104 = vmatprep.subr.bf16.mxu0 %v5379_v37 }
 0xc16   : > { %5116 = vmatprep.subr.bf16.mxu1 %v5379_v37 }
 0xc17   : > { %5089 = vmatmul.mubr.msk.bf16.vlgmr.msra.gmra.mxu0 %vm861_vm2, %v3873_v29  ;;  %v4793_v29 = vld [vmem:[%s6131_s9 + $0x1] ss:$0 sm:$0xff] }
 0xc18   : > { %5101 = vmatmul.mubr.msk.bf16.vlgmr.msra.gmra.mxu1 %vm861_vm2, %v3957_v8  ;;  %5105 = vmatpush3.bf16.msra.mxu0 %v5346_v24 }
 0xc19   : > { %5117 = vmatpush3.bf16.msra.mxu1 %v5347_v47  ;;  %5106 = vmatprep.subr.bf16.mxu0 %v5379_v37 }
 0xc1a   : > { %5118 = vmatprep.subr.bf16.mxu1 %v5379_v37  ;;  %5112 = vmatprep.mubr.msk.bf16.mxu0 %vm5380_vm9, %v5379_v37 }
 0xc1b   : > { %5124 = vmatprep.mubr.msk.bf16.mxu1 %vm5380_vm9, %v5379_v37 }
 0xc1c   : > { %5107 = vmatpush3.bf16.msra.mxu0 %v5348_v10 }
 0xc1d   : > { %5119 = vmatpush3.bf16.msra.mxu1 %v5349_v58  ;;  %5108 = vmatprep.subr.bf16.mxu0 %v5379_v37 }
 0xc1e   : > { %5120 = vmatprep.subr.bf16.mxu1 %v5379_v37 }
 0xc20   : > { %5109 = vmatpush3.bf16.msra.mxu0 %v5350_v31 }
 0xc21   : > { %5121 = vmatpush3.bf16.msra.mxu1 %v5351_v32  ;;  %5110 = vmatprep.subr.bf16.mxu0 %v5379_v37 }
 0xc22   : > { %5122 = vmatprep.subr.bf16.mxu1 %v5379_v37 }
 0xc24   : > { %5111 = vmatpush3.bf16.msra.mxu0 %v5352_v33 }
 0xc25   : > { %5123 = vmatpush3.bf16.msra.mxu1 %v5353_v4  ;;  %5128 = vmatprep.subr.bf16.mxu0 %v5379_v37 }
 0xc26   : > { %5140 = vmatprep.subr.bf16.mxu1 %v5379_v37 }
 0xc27   : > { %5113 = vmatmul.mubr.msk.bf16.vlgmr.msra.gmra.mxu0 %vm861_vm2, %v4043_v38 }
 0xc28   : > { %5125 = vmatmul.mubr.msk.bf16.vlgmr.msra.gmra.mxu1 %vm861_vm2, %v4123_v41  ;;  %5129 = vmatpush3.bf16.msra.mxu0 %v5354_v42 }
 0xc29   : > { %5141 = vmatpush3.bf16.msra.mxu1 %v5355_v0  ;;  %5130 = vmatprep.subr.bf16.mxu0 %v5379_v37 }
 0xc2a   : > { %5142 = vmatprep.subr.bf16.mxu1 %v5379_v37  ;;  %5136 = vmatprep.mubr.msk.bf16.mxu0 %vm5380_vm9, %v5379_v37 }
 0xc2b   : > { %5148 = vmatprep.mubr.msk.bf16.mxu1 %vm5380_vm9, %v5379_v37 }
 0xc2c   : > { %5131 = vmatpush3.bf16.msra.mxu0 %v5356_v53 }
 0xc2d   : > { %5143 = vmatpush3.bf16.msra.mxu1 %v5357_v1  ;;  %5132 = vmatprep.subr.bf16.mxu0 %v5379_v37 }
 0xc2e   : > { %5144 = vmatprep.subr.bf16.mxu1 %v5379_v37 }
 0xc30   : > { %5133 = vmatpush3.bf16.msra.mxu0 %v5358_v11 }
 0xc31   : > { %5145 = vmatpush3.bf16.msra.mxu1 %v5359_v12  ;;  %5134 = vmatprep.subr.bf16.mxu0 %v5379_v37 }
 0xc32   : > { %5146 = vmatprep.subr.bf16.mxu1 %v5379_v37  ;;  %v4727_v37 = vld [vmem:[%s6131_s9] ss:$0 sm:$0xff] }
 0xc34   : > { %5135 = vmatpush3.bf16.msra.mxu0 %v5360_v62 }
 0xc35   : > { %5147 = vmatpush3.bf16.msra.mxu1 %v5361_v2 }
 0xc37   : > { %5137 = vmatmul.mubr.msk.bf16.vlgmr.msra.gmra.mxu0 %vm861_vm2, %v4209_v3 }
 0xc38   : > { %5149 = vmatmul.mubr.msk.bf16.vlgmr.msra.gmra.mxu1 %vm861_vm2, %v4289_v5 }
 0xcd7   : > { %v3935_v51 = vpop.f32.mrf.mxu0 }
 0xcd8   : > { %v4019_v6 = vpop.f32.mrf.mxu1  ;;  %v3945_v19 = vadd.f32 %v4727_v37, %v3935_v51 }
 0xcd9   : > { %v5090_v40 = vpop.f32.mrf.mxu0 }
 0xcda   : > { %v5102_v22 = vpop.f32.mrf.mxu1  ;;  %v4025_v25 = vadd.f32 %v4019_v6, %v3945_v19 }
 0xcdb   : > { %v3938_v55 = vpop.f32.mrf.mxu0 }
 0xcdc   : > { %v4022_v7 = vpop.f32.mrf.mxu1 }
 0xcdd   : > { %v5091_v15 = vpop.f32.mrf.mxu0 }
 0xcde   : > { %v5103_v17 = vpop.f32.mrf.mxu1 }
 0xce7   : > { %v4105_v18 = vpop.f32.mrf.mxu0 }
 0xce8   : > { %v4185_v20 = vpop.f32.mrf.mxu1  ;;  %v4111_v26 = vadd.f32 %v4105_v18, %v4025_v25 }
 0xce9   : > { %v5114_v60 = vpop.f32.mrf.mxu0 }
 0xcea   : > { %v5126_v21 = vpop.f32.mrf.mxu1  ;;  %v4191_v9 = vadd.f32 %v4185_v20, %v4111_v26 }
 0xceb   : > { %v4108_v61 = vpop.f32.mrf.mxu0 }
 0xcec   : > { %v4188_v49 = vpop.f32.mrf.mxu1 }
 0xced   : > { %v5115_v23 = vpop.f32.mrf.mxu0 }
 0xcee   : > { %v5127_v63 = vpop.f32.mrf.mxu1 }
 0xcf7   : > { %v4271_v14 = vpop.f32.mrf.mxu0 }
 0xcf8   : > { %v4277_v39 = vadd.f32 %v4271_v14, %v4191_v9  ;;  %v4351_v27 = vpop.f32.mrf.mxu1 }
 0xcf9   : > { %v5138_v28 = vpop.f32.mrf.mxu0 }
 0xcfa   : > { %v4357_v8 = vadd.f32 %v4351_v27, %v4277_v39  ;;  %v5150_v24 = vpop.f32.mrf.mxu1 }
 0xcfb   : > { %v4274_v56 = vpop.f32.mrf.mxu0 }
 0xcfc   : > { %v4354_v47 = vpop.f32.mrf.mxu1  ;;  %v4362_v16 = vmul.f32 %v4793_v29, %v4357_v8 }
 0xcfd   : > { %v5139_v10 = vpop.f32.mrf.mxu0 }
 0xcfe   : > { %v5151_v48 = vpop.f32.mrf.mxu1  ;;  %v4364_v58 = vsel %vm4363_vm11, %v4362_v16, 0.0 }
 0xcff   : > { %4365 = vadd.xlane.f32.xlu0 %v4364_v58 }
 0xd88   : > { %v4366_v31 = vpop.xlane.xlu0 %4365 }
 0xd89   : > { %v4371_v43 = vadd.f32 %v4794_v30, %v4366_v31 }
 0xd8b   : > { %5362 = vtanh.f32 %v4371_v43 }
 0xd98   : > { %v5363_v32 = vpop.eup %5362 }
 0xd99   : > { %4374 = vst.msk [vmem:[%s6132_s10] sm:$0x3] %vm4373_vm12, %v5363_v32 }
 0xd9a PF: > { %s20_s13 = sadd.s32 1, %s5370_s13  }
 0xd9b   : > { %p17_p6 = scmp.ge.s32.totalorder %s20_s13, 4  }
 0xd9d   :  { %19 = sbr.rel (!%p17_p6) target bundleno = 3 (0x3), region = 117 }

</bundles_post_ra>
